<compile_context>
chip_gen: v7x
topology: tpu7x:2x2x1
jax: 0.10.0
libtpu: 0.0.40
codegen_flags: <defaults>
</compile_context>

<pallas_src>
import math

import jax
import jax.numpy as jnp
from jax import lax
from jax.experimental import pallas as pl
from jax.experimental.pallas import tpu as pltpu

QN = -128.0        # signed 8-bit
QP = 127.0
LN_EPS = 1e-5
ALPHA_EPS = 1e-5
_SQRT_QP = math.sqrt(127.0)


# ----------------------------- kernels ------------------------------------ #

def _ffn1_rowsum_kernel(scal_ref, x_ref, w1s_ref, rowsum_ref):
    """rowsum[r] = sum_j relu( (q1 @ sign(W1)^T)[r, j] )  (integer-domain h, unscaled).

    Out-of-bounds rows of a ragged last tile produce garbage sums but those
    output rows are clipped on write, so no masking is needed.
    """
    a1 = scal_ref[0]
    x = x_ref[...].astype(jnp.float32)
    # q1 is integer-valued in [-128, 127]  ->  exactly representable in bf16.
    q1 = jnp.clip(jnp.round(x / a1), QN, QP).astype(jnp.bfloat16)
    s1 = jnp.dot(q1, w1s_ref[...], preferred_element_type=jnp.float32)
    r = jnp.maximum(s1, 0.0)                      # relu commutes with the >0 scale
    rowsum_ref[...] = jnp.sum(r, axis=-1, keepdims=True)


def _ffn2_fused_kernel(scal_ref, x_ref, w1s_ref, w2s_ref, g_ref, b_ref, o_ref):
    """out = LayerNorm( dequant2( relu( dequant1(x) @ W1_q^T ) ) @ W2_q^T + x )."""
    a1 = scal_ref[0]        # first-linear clip value
    scale1 = scal_ref[1]    # a1 * ||W1||_1 / numel(W1)
    inv_a2 = scal_ref[2]    # 1 / second-linear clip value
    scale2 = scal_ref[3]    # a2 * ||W2||_1 / numel(W2)

    x = x_ref[...].astype(jnp.float32)

    # --- QuantLinear 1 + ReLU (recomputed here; h never goes to HBM) ---
    q1 = jnp.clip(jnp.round(x / a1), QN, QP).astype(jnp.bfloat16)
    s1 = jnp.dot(q1, w1s_ref[...], preferred_element_type=jnp.float32)
    h = jnp.maximum(s1, 0.0) * scale1

    # --- QuantLinear 2 ---
    q2 = jnp.clip(jnp.round(h * inv_a2), QN, QP).astype(jnp.bfloat16)
    s2 = jnp.dot(q2, w2s_ref[...], preferred_element_type=jnp.float32)
    y = s2 * scale2 + x

    # --- residual LayerNorm ---
    mean = jnp.mean(y, axis=-1, keepdims=True)
    c = y - mean
    var = jnp.mean(c * c, axis=-1, keepdims=True)
    yn = c * lax.rsqrt(var + LN_EPS)
    o_ref[...] = (yn * g_ref[...] + b_ref[...]).astype(o_ref.dtype)


# ----------------------------- wrapper ------------------------------------ #

def prepare_bwn_weights(w1, w2):
    """One-time (hoistable) weight prep: layerwise-BWN sign matrices in bf16,
    transposed to (K, N) for the MXU, plus their scalar scales ||W||_1/numel."""
    m1 = (jnp.sum(jnp.abs(w1)) / w1.size).astype(jnp.float32)
    m2 = (jnp.sum(jnp.abs(w2)) / w2.size).astype(jnp.float32)
    w1s = jnp.sign(w1 - jnp.mean(w1)).astype(jnp.bfloat16).T     # (d_model, d_ff)
    w2s = jnp.sign(w2 - jnp.mean(w2)).astype(jnp.bfloat16).T     # (d_ff, d_model)
    return w1s, m1, w2s, m2


def _elastic_alpha_from_mean_abs(mean_abs):
    """First-forward value of the symmetric 8-bit elastic clip parameter."""
    a = 2.0 * mean_abs / _SQRT_QP
    return jnp.where(a > ALPHA_EPS, a, ALPHA_EPS)


def poswise_ffn(x, w1, w2, gamma, beta, *, block_rows=512,
                vmem_limit_bytes=48 * 1024 * 1024):
    """LayerNorm( QuantLinear2(relu(QuantLinear1(x))) + x ), torch-style weights.

    x: (..., d_model);  w1: (d_ff, d_model);  w2: (d_model, d_ff)
    gamma/beta: (d_model,) LayerNorm affine params.
    """
    d_model = x.shape[-1]
    d_ff = w1.shape[0]
    assert w1.shape == (d_ff, d_model) and w2.shape == (d_model, d_ff)
    assert d_model % 128 == 0 and d_ff % 128 == 0, "feature dims must be lane-aligned"

    orig_shape = x.shape
    x2d = x.reshape(-1, d_model)
    M = x2d.shape[0]

    # TODO(synk): for serving, hoist prepare_bwn_weights() out of the per-call
    # path (weights are static); kept inline so this script is self-contained.
    w1s, m1, w2s, m2 = prepare_bwn_weights(w1, w2)

    # First-linear activation clip value (global scalar reduce over x).
    a1 = _elastic_alpha_from_mean_abs(jnp.mean(jnp.abs(x2d))).astype(jnp.float32)

    # Row tile: multiple of 8, >= 2 grid steps whenever possible (megacore /
    # v7x dual-TC), capped at block_rows (bigger tiles amortize per-step
    # overhead and move the mem-bound kernel toward HBM roofline).
    if M <= 8:
        tm = M
    else:
        tm = min(block_rows, max(8, ((pl.cdiv(M, 2) + 7) // 8) * 8))
    grid_m = pl.cdiv(M, tm)

    smem_spec = pl.BlockSpec(memory_space=pltpu.MemorySpace.SMEM)
    cparams = pltpu.CompilerParams(
        dimension_semantics=("parallel",),
        vmem_limit_bytes=vmem_limit_bytes,
    )

    # ---- pass 1: per-row |h| partial sums (integer domain) for the a2 init --
    rowsum = pl.pallas_call(
        _ffn1_rowsum_kernel,
        out_shape=jax.ShapeDtypeStruct((M, 1), jnp.float32),
        grid_spec=pltpu.PrefetchScalarGridSpec(
            num_scalar_prefetch=0,
            grid=(grid_m,),
            in_specs=[
                smem_spec,                                          # a1 scalar
                pl.BlockSpec((tm, d_model), lambda i: (i, 0)),      # x rows
                pl.BlockSpec((d_model, d_ff), lambda i: (0, 0)),    # W1 signs (resident)
            ],
            out_specs=pl.BlockSpec((tm, 1), lambda i: (i, 0)),      # tiny (M*4 B)
        ),
        compiler_params=cparams,
    )(a1.reshape(1), x2d, w1s)

    scale1 = a1 * m1                                   # combined dequant scale of linear 1
    mean_abs_h = jnp.sum(rowsum) * scale1 / (M * d_ff)
    a2 = _elastic_alpha_from_mean_abs(mean_abs_h).astype(jnp.float32)
    scale2 = a2 * m2                                   # combined dequant scale of linear 2

    scalars = jnp.stack([a1, scale1, 1.0 / a2, scale2]).astype(jnp.float32)

    # ---- pass 2: fused quant1+mm1+relu+quant2+mm2+residual+LayerNorm --------
    out2d = pl.pallas_call(
        _ffn2_fused_kernel,
        out_shape=jax.ShapeDtypeStruct((M, d_model), x.dtype),
        grid_spec=pltpu.PrefetchScalarGridSpec(
            num_scalar_prefetch=0,
            grid=(grid_m,),
            in_specs=[
                smem_spec,                                          # scalars
                pl.BlockSpec((tm, d_model), lambda i: (i, 0)),      # x rows (quant + residual)
                pl.BlockSpec((d_model, d_ff), lambda i: (0, 0)),    # W1 signs (resident)
                pl.BlockSpec((d_ff, d_model), lambda i: (0, 0)),    # W2 signs (resident)
                pl.BlockSpec((1, d_model), lambda i: (0, 0)),       # gamma
                pl.BlockSpec((1, d_model), lambda i: (0, 0)),       # beta
            ],
            out_specs=pl.BlockSpec((tm, d_model), lambda i: (i, 0)),
        ),
        compiler_params=cparams,
    )(scalars, x2d, w1s, w2s,
      gamma.reshape(1, d_model).astype(jnp.float32),
      beta.reshape(1, d_model).astype(jnp.float32))

    return out2d.reshape(orig_shape)


# --------------------------- pure-JAX reference ---------------------------- #

def _bwn_quantize_weight(w):
    m = jnp.sum(jnp.abs(w)) / w.size
    e = jnp.mean(w)
    return (jnp.sign(w - e) * m).astype(w.dtype)


def _elastic_alpha(x):
    a = 2.0 * jnp.mean(jnp.abs(x)) / _SQRT_QP
    return jnp.where(a > ALPHA_EPS, a, ALPHA_EPS)


def _reference(x, w1, w2, gamma, beta):
    d_model = x.shape[-1]
    x2d = x.reshape(-1, d_model)
    w1_q = _bwn_quantize_weight(w1)
    w2_q = _bwn_quantize_weight(w2)

    a1 = _elastic_alpha(x2d)
    xq = jnp.clip(jnp.round(x2d / a1), QN, QP) * a1
    h = jnp.maximum(jnp.dot(xq, w1_q.T, precision=lax.Precision.HIGHEST), 0.0)

    a2 = _elastic_alpha(h)
    hq = jnp.clip(jnp.round(h / a2), QN, QP) * a2
    y = jnp.dot(hq, w2_q.T, precision=lax.Precision.HIGHEST) + x2d

    mean = jnp.mean(y, axis=-1, keepdims=True)
    var = jnp.mean((y - mean) ** 2, axis=-1, keepdims=True)
    out = (y - mean) / jnp.sqrt(var + LN_EPS) * gamma + beta
    return out.reshape(x.shape).astype(x.dtype)


if __name__ == "__main__":
    key = jax.random.PRNGKey(0)
    batch, seq = 2, 8
    d_model, d_ff = 512, 1024                     # module defaults from the spec

    kx, k1, k2 = jax.random.split(key, 3)
    x = jax.random.normal(kx, (batch, seq, d_model), dtype=jnp.float32)
    w1 = jax.random.normal(k1, (d_ff, d_model), dtype=jnp.float32) / math.sqrt(d_model)
    w2 = jax.random.normal(k2, (d_model, d_ff), dtype=jnp.float32) / math.sqrt(d_ff)
    gamma = jnp.ones((d_model,), dtype=jnp.float32)   # nn.LayerNorm default init
    beta = jnp.zeros((d_model,), dtype=jnp.float32)

    out = jax.block_until_ready(poswise_ffn(x, w1, w2, gamma, beta))
    ref = jax.block_until_ready(_reference(x, w1, w2, gamma, beta))

    assert out.shape == x.shape and out.dtype == x.dtype
    max_err = float(jnp.max(jnp.abs(out - ref)))
    # Tolerance covers the (exact-integer) matmul factoring: only the order of
    # the scalar-scale multiplications differs from the reference by a few ulps.
    assert jnp.allclose(out, ref, atol=2e-3, rtol=2e-3), f"max_err={max_err}"

    print("KERNEL_OK")
</pallas_src>

<mosaic_0001>
module attributes {stable_mosaic.version = 11 : i64} {
  func.func @_ffn1_rowsum_kernel(%arg0: i32, %arg1: memref<1xf32, #tpu.memory_space<smem>>, %arg2: memref<8x512xf32, #tpu.memory_space<vmem>>, %arg3: memref<512x1024xbf16, #tpu.memory_space<vmem>>, %arg4: memref<8x1xf32, #tpu.memory_space<vmem>>) attributes {dimension_semantics = [#tpu.dimension_semantics<parallel>], iteration_bounds = array<i64: 2>, scalar_prefetch = 0 : i64, scratch_operands = 0 : i64, tpu.core_type = #tpu.core_type<tc>, window_params = [{transform_indices = @transform_0, window_bounds = array<i64: 1>}, {transform_indices = @transform_1, window_bounds = array<i64: 8, 512>}, {pipeline_mode = #tpu.pipeline_mode<synchronous>, transform_indices = @transform_2, window_bounds = array<i64: 512, 1024>}, {transform_indices = @transform_3, window_bounds = array<i64: 8, 1>}]} {
    %c0 = arith.constant 0 : index
    %0 = memref.load %arg1[%c0] : memref<1xf32, #tpu.memory_space<smem>>
    %c0_0 = arith.constant 0 : index
    %c0_1 = arith.constant 0 : index
    %1 = vector.load %arg2[%c0_0, %c0_1] : memref<8x512xf32, #tpu.memory_space<vmem>>, vector<8x512xf32>
    %2 = vector.broadcast %0 : f32 to vector<8x512xf32>
    %3 = arith.divf %1, %2 : vector<8x512xf32>
    %4 = math.roundeven %3 : vector<8x512xf32>
    %cst = arith.constant -1.280000e+02 : f32
    %cst_2 = arith.constant 1.270000e+02 : f32
    %5 = vector.broadcast %cst : f32 to vector<8x512xf32>
    %6 = arith.maximumf %5, %4 : vector<8x512xf32>
    %7 = vector.broadcast %cst_2 : f32 to vector<8x512xf32>
    %8 = arith.minimumf %7, %6 : vector<8x512xf32>
    %9 = arith.truncf %8 : vector<8x512xf32> to vector<8x512xbf16>
    %c0_3 = arith.constant 0 : index
    %c0_4 = arith.constant 0 : index
    %10 = vector.load %arg3[%c0_3, %c0_4] : memref<512x1024xbf16, #tpu.memory_space<vmem>>, vector<512x1024xbf16>
    %cst_5 = arith.constant dense<0.000000e+00> : vector<8x1024xf32>
    %11 = tpu.matmul %9, %10, %cst_5 {dimension_numbers = #tpu.dot_dimension_numbers<[1], [0], [0], [1], [0, 0, 1, 1], [], []>} : vector<8x512xbf16>, vector<512x1024xbf16>, vector<8x1024xf32> -> vector<8x1024xf32>
    %cst_6 = arith.constant 0.000000e+00 : f32
    %12 = vector.broadcast %cst_6 : f32 to vector<8x1024xf32>
    %13 = arith.maximumf %11, %12 : vector<8x1024xf32>
    %cst_7 = arith.constant dense<0.000000e+00> : vector<8xf32>
    %14 = vector.multi_reduction <add>, %13, %cst_7 [1] : vector<8x1024xf32> to vector<8xf32>
    %15 = vector.shape_cast %14 : vector<8xf32> to vector<8x1xf32>
    %c0_8 = arith.constant 0 : index
    %c0_9 = arith.constant 0 : index
    %16 = vector.load %arg4[%c0_8, %c0_9] : memref<8x1xf32, #tpu.memory_space<vmem>>, vector<8x1xf32>
    tpu.vector_store %arg4[%c0_8, %c0_9], %15 {strides = array<i32>} : memref<8x1xf32, #tpu.memory_space<vmem>>, vector<8x1xf32>,
    return
  }
  func.func @transform_0(%arg0: i32) -> i32 {
    %c0_i32 = arith.constant 0 : i32
    %c0_i32_0 = arith.constant 0 : i32
    return %c0_i32 : i32
  }
  func.func @transform_1(%arg0: i32) -> (i32, i32) {
    %c0_i32 = arith.constant 0 : i32
    %c0_i32_0 = arith.constant 0 : i32
    return %arg0, %c0_i32 : i32, i32
  }
  func.func @transform_2(%arg0: i32) -> (i32, i32) {
    %c0_i32 = arith.constant 0 : i32
    %c0_i32_0 = arith.constant 0 : i32
    %c0_i32_1 = arith.constant 0 : i32
    return %c0_i32, %c0_i32_0 : i32, i32
  }
  func.func @transform_3(%arg0: i32) -> (i32, i32) {
    %c0_i32 = arith.constant 0 : i32
    %c0_i32_0 = arith.constant 0 : i32
    return %arg0, %c0_i32 : i32, i32
  }
}

</mosaic_0001>

<bundles_post_ra>
// kernel: tpu_custom_call.1
= control target key start
LH: loop header
LB: loop body
LE: loop exit
PB: predicated region body
PF: predicated region fallthrough
CT: control target
= control target key end

     0   :  { %s2835_s0 = inlined_call_operand.<no memory space> [shape: f32[1], index: 0, kind: input, shape index: {}]   ;;  %s2836_s1 = inlined_call_operand.hbm [shape: f32[16,512], index: 1, kind: input, shape index: {}]   ;;  %s2837_s2 = inlined_call_operand.hbm [shape: bf16[512,1024], index: 2, kind: input, shape index: {}]   ;;  %s2838_s3 = inlined_call_operand.vmem [shape: f32[16,1], index: 3, kind: output, shape index: {}]  }
   0x1   :  { %8 = sst [smem:[#allocation2]] %s2835_s0 }
   0x2   :  { %9 = vsyncpa [#allocation4], 0 }
   0x3   :  { %11 = vsyncpa [#allocation4 + $0x1], 0 }
   0x4   :  { %12 = vsyncpa [#allocation6], 0  ;;  %s2657_s14 = smov 0   ;;  %s2659_s15 = smov 0  }
   0x5   :  { %s2661_s16 = smov 0   ;;  %s2663_s17 = smov 0  }
   0x6 LB: > { %s2676_s0 = sadd.s32 4294967295, %s2628_s17   ;;  %p59_p0 = scmp.ne.s32.totalorder %s2620_s15, %s2616_s14  ;;  %s2628_s17 = sphi %s2663_s17, %s2853_s17   ;;  %s2624_s16 = sphi %s2661_s16, %s2852_s16   ;;  %s2620_s15 = sphi %s2659_s15, %s2851_s15   ;;  %s2616_s14 = sphi %s2657_s14, %s2850_s14  }
   0x7   : > { %p2839_p1 = scmp.eq.s32.totalorder %s2676_s0, 0  ;;  %p2189_p2 = scmp.ge.s32.totalorder %s2628_s17, 1 }
   0x8   : > { %p117_p3 = scmp.lt.s32.totalorder %s2628_s17, 3  ;;  %s2630_s20 = smov [#allocation5]  }
   0x9   : > { %p2684_p4 = por %p2839_p1, %p59_p0  ;;  %s132_s21 = sshll.u32 %s2630_s20, 4  ;;  %s133_s21 = int_to_ptr.vmem [resolvable:$true] %s132_s21 }
   0xa   : > { %p2688_p5 = pnand %p2189_p2, %p117_p3  ;;  %s2701_s23 = sadd.s32 1, %s2628_s17  }
   0xb   : > { %s2842_s18 = scalar_select %p2684_p4, 1, 0 }
   0xc   : > { %s2843_s19 = scalar_select %p2688_p5, 1, 0 }
   0xd   : > { %p2484_p6 = pneg %p2688_p5  ;;  %s46_s24 = sadd.s32 1, %s2624_s16 }
   0xe   : > { %s43_s25 = ssub.s32 %s2628_s17, %s2701_s23  ;;  %s2532_s28 = scalar_lea.hbm %s2837_s2, 32768 }
   0xf   : > { %p2696_p7 = pnand %p2484_p6, %p2839_p1  ;;  %p2533_p8 = scmp.ne.s32.totalorder %s2837_s2, %s2532_s28 }
  0x10   : > { %p2539_p12 = scmp.lt.u32.totalorder %s2532_s28, %s2837_s2 }
  0x11   : > { %p2534_p9 = pneg %p2696_p7 }
  0x13   : > { %p2535_p10 = pnand %p2534_p9, %p2533_p8 }
  0x15   : > { %p2536_p11 = pneg %p2535_p10 }
  0x17   : > { %p2541_p13 = pnand %p2539_p12, %p2536_p11 }
  0x19   : > { %2544 = shalt.err (!%p2541_p13)
}
  0x1a   : > { %s2545_s6 = scalar_lea.vmem %s133_s21, 32768  ;;  %p2553_p6 = scmp.lt.s32.totalorder %s133_s21, %s133_s21 }
  0x1b   : > { %p2546_p0 = scmp.ne.s32.totalorder %s133_s21, %s2545_s6  ;;  %p2554_p1 = scmp.lt.s32.totalorder %s2545_s6, %s2545_s6 }
  0x1d   : > { %p2548_p2 = pnand %p2546_p0, %p2534_p9  ;;  %p2555_p4 = por %p2554_p1, %p2553_p6 }
  0x1f   : > { %p2549_p3 = pneg %p2548_p2 }
  0x21   : > { %p2556_p5 = pnand %p2555_p4, %p2549_p3 }
  0x23   : > { %2559 = shalt.err (!%p2556_p5)
}
  0x24   : > { %s2631_s7 = smov 512   ;;  %s2632_s8 = smov 32  }
  0x25   : > { %2487 = dma.hbm_to_vmem [thread:$0]  (!%p2696_p7), %s2837_s2, 32768, %s133_s21, [#allocation6], %s2631_s7, %s2631_s7, %s2632_s8  }
  0x26   : > { %p44_p8 = scmp.eq.s32.totalorder %s43_s25, 0  ;;  %p53_p9 = scmp.ne.s32.totalorder %s2624_s16, %s2620_s15 }
  0x27   : > { %p54_p1 = scmp.eq.s32.totalorder %s2628_s17, 0  ;;  %p2493_p4 = scmp.lt.s32.totalorder %s2628_s17, 2 }
  0x28   : > { %s2727_s11 = scalar_select %p44_p8, %s2624_s16, %s46_s24  }
  0x29   : > { %p55_p5 = por %p54_p1, %p53_p9  ;;  %s146_s12 = sand.u32 1, %s2624_s16  }
  0x2a   : > { %s2192_s13 = sshll.u32 %s146_s12, 5  ;;  %s2457_s14 = sshll.u32 %s2628_s17, 9 }
  0x2b   : > { %s2734_s27 = scalar_lea.hbm %s2836_s1, %s2457_s14  ;;  %s150_s21 = scalar_lea.vmem [#allocation3], %s2192_s13 }
  0x2c   : > { %s158_s22 = sshll.u32 %s150_s21, 4  ;;  %p2738_p7 = pnand %p2493_p4, %p55_p5  ;;  %s2736_s22 = int_to_ptr.vmem [resolvable:$true] %s158_s22 }
  0x2d   : > { %s147_s17 = scalar_lea.sflag [#allocation4], %s146_s12  ;;  %s2560_s25 = scalar_lea.hbm %s2734_s27, 512 }
  0x2e   : > { %p2561_p10 = scmp.ne.s32.totalorder %s2734_s27, %s2560_s25  ;;  %p2562_p11 = pneg %p2738_p7 }
  0x2f   : > { %s2565_s30 = scalar_lea.hbm %s2836_s1, 1024  ;;  %p2566_p0 = scmp.lt.u32.totalorder %s2734_s27, %s2836_s1 }
  0x30   : > { %p2563_p12 = pnand %p2562_p11, %p2561_p10  ;;  %p2567_p2 = scmp.lt.u32.totalorder %s2565_s30, %s2560_s25 }
  0x31   : > { %p2569_p6 = scmp.lt.u32.totalorder %s2560_s25, %s2734_s27 }
  0x32   : > { %p2564_p13 = pneg %p2563_p12  ;;  %p2568_p3 = por %p2567_p2, %p2566_p0 }
  0x34   : > { %p2570_p8 = por %p2569_p6, %p2568_p3 }
  0x36   : > { %p2571_p9 = pnand %p2570_p8, %p2564_p13 }
  0x38   : > { %2574 = shalt.err (!%p2571_p9)
}
  0x39   : > { %s2575_s6 = scalar_lea.vmem %s2736_s22, 512  ;;  %s2633_s7 = smov [#allocation3]  }
  0x3a   : > { %p2576_p1 = scmp.ne.s32.totalorder %s2736_s22, %s2575_s6  ;;  %s2580_s8 = sshll.u32 %s2633_s7, 4  ;;  %s2581_s8 = int_to_ptr.vmem [resolvable:$false] %s2580_s8 }
  0x3b   : > { %s2582_s9 = scalar_lea.vmem %s2581_s8, 1024  ;;  %p2583_p10 = scmp.lt.s32.totalorder %s2736_s22, %s2581_s8 }
  0x3c   : > { %p2578_p4 = pnand %p2576_p1, %p2562_p11  ;;  %p2584_p12 = scmp.lt.s32.totalorder %s2582_s9, %s2575_s6 }
  0x3e   : > { %p2579_p5 = pneg %p2578_p4  ;;  %p2585_p0 = por %p2584_p12, %p2583_p10 }
  0x40   : > { %p2586_p2 = pnand %p2585_p0, %p2579_p5 }
  0x42   : > { %2589 = shalt.err (!%p2586_p2)
}
  0x43   : > { %2491 = dma.hbm_to_vmem [thread:$0]  (!%p2738_p7), %s2734_s27, 512, %s2736_s22, %s147_s17  }
  0x44   : > { %p2846_p13 = scmp.ne.s32.totalorder %s2843_s19, 0 }
  0x45   : > { %s169_s10 = sand.u32 (!%p2846_p13), 1, %s2620_s15   ;;  %p2847_p11 = scmp.ne.s32.totalorder (!%p2846_p13), %s2842_s18, 0 }
  0x46   : > { %167 = sbr.rel (%p2846_p13) target bundleno = 706 (0x2c2), region = 32  ;;  %s2196_s12 = sshll.u32 (!%p2846_p13), %s169_s10, 5 }
  0x47   : > { %s170_s13 = scalar_lea.sflag (!%p2846_p13), [#allocation4], %s169_s10  ;;  %s2770_s14 = scalar_lea.vmem (!%p2846_p13), [#allocation3], %s2196_s12 }
  0x4d   : > { %2607 = dma.done.wait (%p2847_p11), %s170_s13, 512  }
  0x4e   : > { %2609 = vsyncadd (%p2847_p11), %s170_s13, 4294966784  ;;  %p2848_p3 = scmp.eq.s32.totalorder %s2676_s0, 0 }
  0x50   : > { %2611 = dma.done.wait (%p2848_p3), [#allocation6], 32768   ;;  %p2849_p7 = pmov %p2848_p3 }
  0x51   : > { %s2780_s19 = sld [smem:[#allocation2]]  ;;  %v230_v0 = vld [vmem:[#allocation5] sm:$0xff]  ;;  %v231_v2 = vld [vmem:[#allocation5 + $0x8] sm:$0xff]  ;;  %p199_p6 = scmp.lt.s32.totalorder %s2676_s0, 1  ;;  %vm2111_vm0 = vcmask 7168  }
  0x52   : > { %2613 = vsyncadd (%p2849_p7), [#allocation6], 4294934528  ;;  %v234_v1 = vld [vmem:[#allocation5 + $0x20] sm:$0xff]  ;;  %v235_v4 = vld [vmem:[#allocation5 + $0x28] sm:$0xff] }
  0x53   : > { %v2200_v3 = vcombine.high %v230_v0, %v234_v1  ;;  %v2199_v5 = vcombine.low %v230_v0, %v234_v1  ;;  %v238_v6 = vld [vmem:[#allocation5 + $0x40] sm:$0xff]  ;;  %v2202_v8 = vcombine.high %v231_v2, %v235_v4  ;;  %v2201_v9 = vcombine.low %v231_v2, %v235_v4  ;;  %v239_v11 = vld [vmem:[#allocation5 + $0x48] sm:$0xff]  ;;  %s2855_s0 = smov (!%p199_p6, %s2676_s0), 1 }
  0x54   : > { %v242_v7 = vld [vmem:[#allocation5 + $0x60] sm:$0xff]  ;;  %v243_v12 = vld [vmem:[#allocation5 + $0x68] sm:$0xff]  ;;  %s2198_s18 = sshll.u32 %s2855_s0, 3 }
  0x55   : > { %v2208_v10 = vcombine.high %v238_v6, %v242_v7  ;;  %v246_v13 = vld [vmem:[#allocation5 + $0x80] sm:$0xff]  ;;  %1766 = vmatprep.subr.bf16.mxu0 %v2200_v3  ;;  %v2210_v14 = vcombine.high %v239_v11, %v243_v12  ;;  %v247_v16 = vld [vmem:[#allocation5 + $0x88] sm:$0xff]  ;;  %1848 = vmatprep.subr.bf16.mxu1 %v2202_v8  ;;  %v2207_v18 = vcombine.low %v238_v6, %v242_v7  ;;  %s202_s27 = scalar_lea.vmem %s2838_s3, %s2198_s18 }
  0x56   : > { %v250_v15 = vld [vmem:[#allocation5 + $0xa0] sm:$0xff]  ;;  %v251_v17 = vld [vmem:[#allocation5 + $0xa8] sm:$0xff]  ;;  %1767 = vmatpush1.bf16.msra.mxu0 %v2199_v5  ;;  %1849 = vmatpush1.bf16.msra.mxu1 %v2201_v9  ;;  %v2209_v19 = vcombine.low %v239_v11, %v243_v12 }
  0x57   : > { %1768 = vmatprep.subr.bf16.mxu0 %v2208_v10  ;;  %v2216_v20 = vcombine.high %v246_v13, %v250_v15  ;;  %1850 = vmatprep.subr.bf16.mxu1 %v2210_v14  ;;  %v2218_v21 = vcombine.high %v247_v16, %v251_v17  ;;  %v254_v22 = vld [vmem:[#allocation5 + $0xc0] sm:$0xff]  ;;  %v208_v24 = vstv %s2780_s19  ;;  %v255_v25 = vld [vmem:[#allocation5 + $0xc8] sm:$0xff]  ;;  %v2215_v27 = vcombine.low %v246_v13, %v250_v15 }
  0x58   : > { %v258_v23 = vld [vmem:[#allocation5 + $0xe0] sm:$0xff]  ;;  %v259_v26 = vld [vmem:[#allocation5 + $0xe8] sm:$0xff]  ;;  %v2217_v28 = vcombine.low %v247_v16, %v251_v17  ;;  %2530 = vrcp.f32 %v208_v24 }
  0x59   : > { %v2224_v29 = vcombine.high %v254_v22, %v258_v23  ;;  %v2226_v30 = vcombine.high %v255_v25, %v259_v26  ;;  %v262_v31 = vld [vmem:[#allocation5 + $0x100] sm:$0xff]  ;;  %v263_v33 = vld [vmem:[#allocation5 + $0x108] sm:$0xff]  ;;  %v2223_v35 = vcombine.low %v254_v22, %v258_v23  ;;  %v2225_v36 = vcombine.low %v255_v25, %v259_v26 }
  0x5a   : > { %1769 = vmatpush1.bf16.msra.mxu0 %v2207_v18  ;;  %1851 = vmatpush1.bf16.msra.mxu1 %v2209_v19  ;;  %v266_v32 = vld [vmem:[#allocation5 + $0x120] sm:$0xff]  ;;  %v267_v34 = vld [vmem:[#allocation5 + $0x128] sm:$0xff] }
  0x5b   : > { %1770 = vmatprep.subr.bf16.mxu0 %v2216_v20  ;;  %1852 = vmatprep.subr.bf16.mxu1 %v2218_v21  ;;  %v2232_v37 = vcombine.high %v262_v31, %v266_v32  ;;  %v2234_v38 = vcombine.high %v263_v33, %v267_v34  ;;  %v270_v39 = vld [vmem:[#allocation5 + $0x140] sm:$0xff]  ;;  %v271_v41 = vld [vmem:[#allocation5 + $0x148] sm:$0xff]  ;;  %v2231_v43 = vcombine.low %v262_v31, %v266_v32 }
  0x5c   : > { %v274_v40 = vld [vmem:[#allocation5 + $0x160] sm:$0xff]  ;;  %v275_v42 = vld [vmem:[#allocation5 + $0x168] sm:$0xff]  ;;  %v2233_v44 = vcombine.low %v263_v33, %v267_v34 }
  0x5d   : > { %v2240_v45 = vcombine.high %v270_v39, %v274_v40  ;;  %v2242_v46 = vcombine.high %v271_v41, %v275_v42  ;;  %v278_v47 = vld [vmem:[#allocation5 + $0x180] sm:$0xff]  ;;  %v279_v50 = vld [vmem:[#allocation5 + $0x188] sm:$0xff]  ;;  %v2239_v52 = vcombine.low %v270_v39, %v274_v40  ;;  %v2241_v53 = vcombine.low %v271_v41, %v275_v42 }
  0x5e   : > { %1771 = vmatpush1.bf16.msra.mxu0 %v2215_v27  ;;  %1853 = vmatpush1.bf16.msra.mxu1 %v2217_v28  ;;  %v282_v48 = vld [vmem:[#allocation5 + $0x1a0] sm:$0xff]  ;;  %v283_v51 = vld [vmem:[#allocation5 + $0x1a8] sm:$0xff] }
  0x5f   : > { %1772 = vmatprep.subr.bf16.mxu0 %v2224_v29  ;;  %1854 = vmatprep.subr.bf16.mxu1 %v2226_v30  ;;  %v2248_v54 = vcombine.high %v278_v47, %v282_v48  ;;  %v205_v55 = vld [vmem:[%s2770_s14 + $0x8] sm:$0xff]  ;;  %v2250_v56 = vcombine.high %v279_v50, %v283_v51  ;;  %v286_v57 = vld [vmem:[#allocation5 + $0x1c0] sm:$0xff]  ;;  %v2247_v62 = vcombine.low %v278_v47, %v282_v48 }
  0x60   : > { %v290_v58 = vld [vmem:[#allocation5 + $0x1e0] sm:$0xff]  ;;  %v287_v60 = vld [vmem:[#allocation5 + $0x1c8] sm:$0xff]  ;;  %v2249_v0 = vcombine.low %v279_v50, %v283_v51 }
  0x61   : > { %v291_v61 = vld [vmem:[#allocation5 + $0x1e8] sm:$0xff]  ;;  %v2256_v1 = vcombine.high %v286_v57, %v290_v58  ;;  %v294_v3 = vld [vmem:[#allocation5 + $0x200] sm:$0xff]  ;;  %v2255_v8 = vcombine.low %v286_v57, %v290_v58 }
  0x62   : > { %1773 = vmatpush1.bf16.msra.mxu0 %v2223_v35  ;;  %1855 = vmatpush1.bf16.msra.mxu1 %v2225_v36  ;;  %v2783_v49 = vpop.eup %2530  ;;  %v2258_v2 = vcombine.high %v287_v60, %v291_v61  ;;  %v298_v4 = vld [vmem:[#allocation5 + $0x220] sm:$0xff]  ;;  %v295_v6 = vld [vmem:[#allocation5 + $0x208] sm:$0xff]  ;;  %v2257_v10 = vcombine.low %v287_v60, %v291_v61 }
  0x63   : > { %1774 = vmatprep.subr.bf16.mxu0 %v2232_v37  ;;  %1856 = vmatprep.subr.bf16.mxu1 %v2234_v38  ;;  %v211_v59 = vmul.f32 %v2783_v49, %v205_v55  ;;  %v299_v7 = vld [vmem:[#allocation5 + $0x228] sm:$0xff]  ;;  %v2264_v11 = vcombine.high %v294_v3, %v298_v4  ;;  %v302_v13 = vld [vmem:[#allocation5 + $0x240] sm:$0xff]  ;;  %v2263_v18 = vcombine.low %v294_v3, %v298_v4 }
  0x64   : > { %v2266_v12 = vcombine.high %v295_v6, %v299_v7  ;;  %v306_v14 = vld [vmem:[#allocation5 + $0x260] sm:$0xff]  ;;  %v303_v16 = vld [vmem:[#allocation5 + $0x248] sm:$0xff]  ;;  %v2265_v19 = vcombine.low %v295_v6, %v299_v7 }
  0x65   : > { %v2475_v63 = vround.rtne.f32 %v211_v59  ;;  %v307_v17 = vld [vmem:[#allocation5 + $0x268] sm:$0xff]  ;;  %v2272_v20 = vcombine.high %v302_v13, %v306_v14  ;;  %v310_v22 = vld [vmem:[#allocation5 + $0x280] sm:$0xff]  ;;  %v2271_v26 = vcombine.low %v302_v13, %v306_v14 }
  0x66   : > { %1775 = vmatpush1.bf16.msra.mxu0 %v2231_v43  ;;  %1857 = vmatpush1.bf16.msra.mxu1 %v2233_v44  ;;  %v2274_v21 = vcombine.high %v303_v16, %v307_v17  ;;  %v314_v23 = vld [vmem:[#allocation5 + $0x2a0] sm:$0xff]  ;;  %v311_v24 = vld [vmem:[#allocation5 + $0x288] sm:$0xff]  ;;  %v2273_v27 = vcombine.low %v303_v16, %v307_v17 }
  0x67   : > { %1776 = vmatprep.subr.bf16.mxu0 %v2240_v45  ;;  %1858 = vmatprep.subr.bf16.mxu1 %v2242_v46  ;;  %v219_v5 = vmax.f32 %v2475_v63, -128.0  ;;  %v315_v25 = vld [vmem:[#allocation5 + $0x2a8] sm:$0xff]  ;;  %v2280_v28 = vcombine.high %v310_v22, %v314_v23  ;;  %v318_v30 = vld [vmem:[#allocation5 + $0x2c0] sm:$0xff]  ;;  %v2279_v34 = vcombine.low %v310_v22, %v314_v23 }
  0x68   : > { %v2282_v29 = vcombine.high %v311_v24, %v315_v25  ;;  %v322_v31 = vld [vmem:[#allocation5 + $0x2e0] sm:$0xff]  ;;  %v319_v32 = vld [vmem:[#allocation5 + $0x2c8] sm:$0xff]  ;;  %v2281_v35 = vcombine.low %v311_v24, %v315_v25 }
  0x69   : > { %v223_v9 = vmin.f32 %v219_v5, 127.0  ;;  %v323_v33 = vld [vmem:[#allocation5 + $0x2e8] sm:$0xff]  ;;  %v2288_v36 = vcombine.high %v318_v30, %v322_v31  ;;  %v326_v38 = vld [vmem:[#allocation5 + $0x300] sm:$0xff]  ;;  %v2287_v42 = vcombine.low %v318_v30, %v322_v31 }
  0x6a   : > { %1777 = vmatpush1.bf16.msra.mxu0 %v2239_v52  ;;  %1859 = vmatpush1.bf16.msra.mxu1 %v2241_v53  ;;  %v2290_v37 = vcombine.high %v319_v32, %v323_v33  ;;  %v330_v39 = vld [vmem:[#allocation5 + $0x320] sm:$0xff]  ;;  %v327_v40 = vld [vmem:[#allocation5 + $0x308] sm:$0xff]  ;;  %v2289_v44 = vcombine.low %v319_v32, %v323_v33  ;;  %v207_v53 = vld [vmem:[%s2770_s14 + $0x18] sm:$0xff] }
  0x6b   : > { %1778 = vmatprep.subr.bf16.mxu0 %v2248_v54  ;;  %1860 = vmatprep.subr.bf16.mxu1 %v2250_v56  ;;  %v2787_v15 = vpack.c.bf16 %v223_v9, %v223_v9  ;;  %v331_v41 = vld [vmem:[#allocation5 + $0x328] sm:$0xff]  ;;  %v204_v43 = vld [vmem:[%s2770_s14] sm:$0xff]  ;;  %v2296_v45 = vcombine.high %v326_v38, %v330_v39  ;;  %v2295_v54 = vcombine.low %v326_v38, %v330_v39 }
  0x6c   : > { %v2298_v46 = vcombine.high %v327_v40, %v331_v41  ;;  %v334_v47 = vld [vmem:[#allocation5 + $0x340] sm:$0xff]  ;;  %v335_v50 = vld [vmem:[#allocation5 + $0x348] sm:$0xff]  ;;  %v210_v52 = vmul.f32 %v2783_v49, %v204_v43  ;;  %v2297_v55 = vcombine.low %v327_v40, %v331_v41  ;;  %v213_v60 = vmul.f32 %v2783_v49, %v207_v53 }
  0x6d   : > { %1798 = vmatprep.mubr.bf16.mxu0 %v2787_v15  ;;  %1880 = vmatprep.mubr.bf16.mxu1 %v2787_v15  ;;  %v338_v48 = vld [vmem:[#allocation5 + $0x360] sm:$0xff]  ;;  %v339_v51 = vld [vmem:[#allocation5 + $0x368] sm:$0xff] }
  0x6e   : > { %1779 = vmatpush1.bf16.msra.mxu0 %v2247_v62  ;;  %1861 = vmatpush1.bf16.msra.mxu1 %v2249_v0  ;;  %v2304_v56 = vcombine.high %v334_v47, %v338_v48  ;;  %v2306_v57 = vcombine.high %v335_v50, %v339_v51  ;;  %v342_v58 = vld [vmem:[#allocation5 + $0x380] sm:$0xff]  ;;  %v343_v61 = vld [vmem:[#allocation5 + $0x388] sm:$0xff]  ;;  %v2474_v63 = vround.rtne.f32 %v210_v52  ;;  %v2303_v0 = vcombine.low %v334_v47, %v338_v48 }
  0x6f   : > { %1780 = vmatprep.subr.bf16.mxu0 %v2256_v1  ;;  %1862 = vmatprep.subr.bf16.mxu1 %v2258_v2  ;;  %v346_v59 = vld [vmem:[#allocation5 + $0x3a0] sm:$0xff]  ;;  %v347_v62 = vld [vmem:[#allocation5 + $0x3a8] sm:$0xff]  ;;  %v2305_v1 = vcombine.low %v335_v50, %v339_v51  ;;  %v2477_v6 = vround.rtne.f32 %v213_v60 }
  0x70   : > { %v2312_v2 = vcombine.high %v342_v58, %v346_v59  ;;  %v2314_v3 = vcombine.high %v343_v61, %v347_v62  ;;  %v350_v4 = vld [vmem:[#allocation5 + $0x3c0] sm:$0xff]  ;;  %v351_v7 = vld [vmem:[#allocation5 + $0x3c8] sm:$0xff]  ;;  %v218_v9 = vmax.f32 %v2474_v63, -128.0 }
  0x71   : > { %v354_v5 = vld [vmem:[#allocation5 + $0x3e0] sm:$0xff]  ;;  %v221_v17 = vmax.f32 %v2477_v6, -128.0  ;;  %v371_v30 = vld [vmem:[#allocation5 + $0x468] sm:$0xff] }
  0x72   : > { %1781 = vmatpush1.bf16.msra.mxu0 %v2255_v8  ;;  %1863 = vmatpush1.bf16.msra.mxu1 %v2257_v10  ;;  %v355_v8 = vld [vmem:[#allocation5 + $0x3e8] sm:$0xff]  ;;  %v2311_v10 = vcombine.low %v342_v58, %v346_v59  ;;  %v358_v14 = vld [vmem:[#allocation5 + $0x400] sm:$0xff] }
  0x73   : > { %1782 = vmatprep.subr.bf16.mxu0 %v2264_v11  ;;  %1864 = vmatprep.subr.bf16.mxu1 %v2266_v12  ;;  %v2313_v11 = vcombine.low %v343_v61, %v347_v62  ;;  %v2320_v12 = vcombine.high %v350_v4, %v354_v5  ;;  %v2322_v13 = vcombine.high %v351_v7, %v355_v8  ;;  %v362_v16 = vld [vmem:[#allocation5 + $0x420] sm:$0xff]  ;;  %v375_v38 = vld [vmem:[#allocation5 + $0x488] sm:$0xff] }
  0x74   : > { %v2321_v22 = vcombine.low %v351_v7, %v355_v8  ;;  %v2328_v23 = vcombine.high %v358_v14, %v362_v16  ;;  %v366_v25 = vld [vmem:[#allocation5 + $0x440] sm:$0xff]  ;;  %v2327_v31 = vcombine.low %v358_v14, %v362_v16  ;;  %v379_v39 = vld [vmem:[#allocation5 + $0x4a8] sm:$0xff] }
  0x75   : > { %v2346_v43 = vcombine.high %v375_v38, %v379_v39  ;;  %v387_v47 = vld [vmem:[#allocation5 + $0x4e8] sm:$0xff]  ;;  %v2345_v50 = vcombine.low %v375_v38, %v379_v39  ;;  %v390_v53 = vld [vmem:[#allocation5 + $0x500] sm:$0xff] }
  0x76   : > { %1783 = vmatpush1.bf16.msra.mxu0 %v2263_v18  ;;  %1865 = vmatpush1.bf16.msra.mxu1 %v2265_v19  ;;  %v359_v18 = vld [vmem:[#allocation5 + $0x408] sm:$0xff]  ;;  %v398_v61 = vld [vmem:[#allocation5 + $0x540] sm:$0xff] }
  0x77   : > { %1784 = vmatprep.subr.bf16.mxu0 %v2272_v20  ;;  %1866 = vmatprep.subr.bf16.mxu1 %v2274_v21  ;;  %v363_v19 = vld [vmem:[#allocation5 + $0x428] sm:$0xff]  ;;  %v222_v20 = vmin.f32 %v218_v9, 127.0  ;;  %v2319_v21 = vcombine.low %v350_v4, %v354_v5  ;;  %v402_v62 = vld [vmem:[#allocation5 + $0x560] sm:$0xff] }
  0x78   : > { %v2330_v24 = vcombine.high %v359_v18, %v363_v19  ;;  %v2329_v32 = vcombine.low %v359_v18, %v363_v19  ;;  %v399_v63 = vld [vmem:[#allocation5 + $0x548] sm:$0xff]  ;;  %v406_v5 = vld [vmem:[#allocation5 + $0x580] sm:$0xff]  ;;  %v2367_v9 = vcombine.low %v398_v61, %v402_v62 }
  0x79   : > { %v410_v6 = vld [vmem:[#allocation5 + $0x5a0] sm:$0xff]  ;;  %v407_v7 = vld [vmem:[#allocation5 + $0x588] sm:$0xff] }
  0x7a   : > { %1785 = vmatpush1.bf16.msra.mxu0 %v2271_v26  ;;  %1867 = vmatpush1.bf16.msra.mxu1 %v2273_v27  ;;  %v370_v26 = vld [vmem:[#allocation5 + $0x460] sm:$0xff]  ;;  %v225_v27 = vmin.f32 %v221_v17, 127.0  ;;  %v411_v8 = vld [vmem:[#allocation5 + $0x5a8] sm:$0xff]  ;;  %v2375_v18 = vcombine.low %v406_v5, %v410_v6 }
  0x7b   : > { %1786 = vmatprep.subr.bf16.mxu0 %v2280_v28  ;;  %1868 = vmatprep.subr.bf16.mxu1 %v2282_v29  ;;  %v2795_v28 = vpack.c.bf16 %v222_v20, %v222_v20  ;;  %v367_v29 = vld [vmem:[#allocation5 + $0x448] sm:$0xff]  ;;  %v2336_v33 = vcombine.high %v366_v25, %v370_v26  ;;  %v2335_v40 = vcombine.low %v366_v25, %v370_v26  ;;  %v418_v14 = vld [vmem:[#allocation5 + $0x5e0] sm:$0xff] }
  0x7c   : > { %v2337_v41 = vcombine.low %v367_v29, %v371_v30  ;;  %v415_v16 = vld [vmem:[#allocation5 + $0x5c8] sm:$0xff]  ;;  %v2377_v19 = vcombine.low %v407_v7, %v411_v8 }
  0x7d   : > { %v419_v17 = vld [vmem:[#allocation5 + $0x5e8] sm:$0xff] }
  0x7e   : > { %1787 = vmatpush1.bf16.msra.mxu0 %v2279_v34  ;;  %1869 = vmatpush1.bf16.msra.mxu1 %v2281_v35  ;;  %v2338_v34 = vcombine.high %v367_v29, %v371_v30  ;;  %v374_v35 = vld [vmem:[#allocation5 + $0x480] sm:$0xff]  ;;  %v427_v25 = vld [vmem:[#allocation5 + $0x628] sm:$0xff] }
  0x7f   : > { %1788 = vmatprep.subr.bf16.mxu0 %v2288_v36  ;;  %1870 = vmatprep.subr.bf16.mxu1 %v2290_v37  ;;  %v378_v36 = vld [vmem:[#allocation5 + $0x4a0] sm:$0xff]  ;;  %v2797_v37 = vpack.c.bf16 %v225_v27, %v225_v27  ;;  %v2385_v27 = vcombine.low %v415_v16, %v419_v17 }
  0x80   : > { %v2343_v48 = vcombine.low %v374_v35, %v378_v36 }
  0x82   : > { %1789 = vmatpush1.bf16.msra.mxu0 %v2287_v42  ;;  %1871 = vmatpush1.bf16.msra.mxu1 %v2289_v44  ;;  %v2344_v42 = vcombine.high %v374_v35, %v378_v36  ;;  %v382_v44 = vld [vmem:[#allocation5 + $0x4c0] sm:$0xff] }
  0x83   : > { %1790 = vmatprep.subr.bf16.mxu0 %v2296_v45  ;;  %1872 = vmatprep.subr.bf16.mxu1 %v2298_v46  ;;  %v386_v45 = vld [vmem:[#allocation5 + $0x4e0] sm:$0xff]  ;;  %v383_v46 = vld [vmem:[#allocation5 + $0x4c8] sm:$0xff] }
  0x84   : > { %v2352_v51 = vcombine.high %v382_v44, %v386_v45  ;;  %v2354_v52 = vcombine.high %v383_v46, %v387_v47  ;;  %v2353_v58 = vcombine.low %v383_v46, %v387_v47 }
  0x86   : > { %1791 = vmatpush1.bf16.msra.mxu0 %v2295_v54  ;;  %1873 = vmatpush1.bf16.msra.mxu1 %v2297_v55  ;;  %v394_v54 = vld [vmem:[#allocation5 + $0x520] sm:$0xff]  ;;  %v391_v55 = vld [vmem:[#allocation5 + $0x508] sm:$0xff] }
  0x87   : > { %1792 = vmatprep.subr.bf16.mxu0 %v2304_v56  ;;  %1874 = vmatprep.subr.bf16.mxu1 %v2306_v57  ;;  %v395_v56 = vld [vmem:[#allocation5 + $0x528] sm:$0xff]  ;;  %v2351_v57 = vcombine.low %v382_v44, %v386_v45  ;;  %v2360_v59 = vcombine.high %v390_v53, %v394_v54 }
  0x88   : > { %v2362_v60 = vcombine.high %v391_v55, %v395_v56 }
  0x8a   : > { %1793 = vmatpush1.bf16.msra.mxu0 %v2303_v0  ;;  %1875 = vmatpush1.bf16.msra.mxu1 %v2305_v1  ;;  %v403_v0 = vld [vmem:[#allocation5 + $0x568] sm:$0xff]  ;;  %v2359_v1 = vcombine.low %v390_v53, %v394_v54 }
  0x8b   : > { %1794 = vmatprep.subr.bf16.mxu0 %v2312_v2  ;;  %1876 = vmatprep.subr.bf16.mxu1 %v2314_v3  ;;  %v2361_v2 = vcombine.low %v391_v55, %v395_v56  ;;  %v2368_v3 = vcombine.high %v398_v61, %v402_v62  ;;  %v2370_v4 = vcombine.high %v399_v63, %v403_v0  ;;  %v206_v62 = vld [vmem:[%s2770_s14 + $0x10] sm:$0xff] }
  0x8e   : > { %1795 = vmatpush1.bf16.msra.mxu0 %v2311_v10  ;;  %1877 = vmatpush1.bf16.msra.mxu1 %v2313_v11  ;;  %v2369_v10 = vcombine.low %v399_v63, %v403_v0  ;;  %v2376_v11 = vcombine.high %v406_v5, %v410_v6  ;;  %v467_v5 = vld [vmem:[#allocation5 + $0x768] sm:$0xff]  ;;  %v212_v6 = vmul.f32 %v2783_v49, %v206_v62 }
  0x8f   : > { %1796 = vmatprep.subr.bf16.mxu0 %v2320_v12  ;;  %1878 = vmatprep.subr.bf16.mxu1 %v2322_v13  ;;  %v2378_v12 = vcombine.high %v407_v7, %v411_v8  ;;  %v414_v13 = vld [vmem:[#allocation5 + $0x5c0] sm:$0xff] }
  0x90   : > { %v2384_v20 = vcombine.high %v414_v13, %v418_v14  ;;  %v2383_v26 = vcombine.low %v414_v13, %v418_v14  ;;  %v471_v13 = vld [vmem:[#allocation5 + $0x788] sm:$0xff] }
  0x91   : > { %v475_v14 = vld [vmem:[#allocation5 + $0x7a8] sm:$0xff] }
  0x92   : > { %1797 = vmatpush1.bf16.msra.mxu0 %v2319_v21  ;;  %1879 = vmatpush1.bf16.msra.mxu1 %v2321_v22  ;;  %v2386_v21 = vcombine.high %v415_v16, %v419_v17  ;;  %v422_v22 = vld [vmem:[#allocation5 + $0x600] sm:$0xff]  ;;  %v2476_v16 = vround.rtne.f32 %v212_v6  ;;  %v2442_v49 = vcombine.high %v471_v13, %v475_v14 }
  0x93   : > { %1807 = vmatprep.subr.bf16.mxu0 %v2328_v23  ;;  %1889 = vmatprep.subr.bf16.mxu1 %v2330_v24  ;;  %v426_v23 = vld [vmem:[#allocation5 + $0x620] sm:$0xff]  ;;  %v423_v24 = vld [vmem:[#allocation5 + $0x608] sm:$0xff] }
  0x94   : > { %v2392_v29 = vcombine.high %v422_v22, %v426_v23  ;;  %v2394_v30 = vcombine.high %v423_v24, %v427_v25  ;;  %v2391_v35 = vcombine.low %v422_v22, %v426_v23  ;;  %v2393_v36 = vcombine.low %v423_v24, %v427_v25  ;;  %v479_v22 = vld [vmem:[#allocation5 + $0x7c8] sm:$0xff] }
  0x95   : > { %1799 = vmatmul.mubr.bf16.vlgmr.msra.gmra.mrb[0].mxu0 %v2795_v28  ;;  %1881 = vmatmul.mubr.bf16.vlgmr.msra.gmra.mrb[0].mxu1 %v2795_v28  ;;  %v483_v23 = vld [vmem:[#allocation5 + $0x7e8] sm:$0xff]  ;;  %v220_v24 = vmax.f32 %v2476_v16, -128.0 }
  0x96   : > { %1808 = vmatpush1.bf16.msra.mxu0 %v2327_v31  ;;  %1890 = vmatpush1.bf16.msra.mxu1 %v2329_v32  ;;  %v430_v31 = vld [vmem:[#allocation5 + $0x640] sm:$0xff] }
  0x97   : > { %1809 = vmatprep.subr.bf16.mxu0 %v2336_v33  ;;  %1891 = vmatprep.subr.bf16.mxu1 %v2338_v34  ;;  %v434_v32 = vld [vmem:[#allocation5 + $0x660] sm:$0xff]  ;;  %v431_v33 = vld [vmem:[#allocation5 + $0x648] sm:$0xff] }
  0x98   : > { %1839 = vmatprep.mubr.bf16.mxu0 %v2797_v37  ;;  %1921 = vmatprep.mubr.bf16.mxu1 %v2797_v37  ;;  %v435_v34 = vld [vmem:[#allocation5 + $0x668] sm:$0xff]  ;;  %v2400_v38 = vcombine.high %v430_v31, %v434_v32  ;;  %v2399_v44 = vcombine.low %v430_v31, %v434_v32  ;;  %v236_v31 = vld [vmem:[#allocation5 + $0x30] sm:$0xff]  ;;  %v224_v32 = vmin.f32 %v220_v24, 127.0 }
  0x99   : > { %v2402_v39 = vcombine.high %v431_v33, %v435_v34  ;;  %v2401_v45 = vcombine.low %v431_v33, %v435_v34  ;;  %v233_v33 = vld [vmem:[#allocation5 + $0x18] sm:$0xff] }
  0x9a   : > { %1810 = vmatpush1.bf16.msra.mxu0 %v2335_v40  ;;  %1892 = vmatpush1.bf16.msra.mxu1 %v2337_v41  ;;  %v438_v40 = vld [vmem:[#allocation5 + $0x680] sm:$0xff]  ;;  %v237_v34 = vld [vmem:[#allocation5 + $0x38] sm:$0xff] }
  0x9b   : > { %1811 = vmatprep.subr.bf16.mxu0 %v2344_v42  ;;  %1893 = vmatprep.subr.bf16.mxu1 %v2346_v43  ;;  %v442_v41 = vld [vmem:[#allocation5 + $0x6a0] sm:$0xff]  ;;  %v439_v42 = vld [vmem:[#allocation5 + $0x688] sm:$0xff] }
  0x9c   : > { %v443_v43 = vld [vmem:[#allocation5 + $0x6a8] sm:$0xff]  ;;  %v2408_v46 = vcombine.high %v438_v40, %v442_v41  ;;  %v2407_v53 = vcombine.low %v438_v40, %v442_v41  ;;  %v240_v40 = vld [vmem:[#allocation5 + $0x50] sm:$0xff] }
  0x9d   : > { %v2410_v47 = vcombine.high %v439_v42, %v443_v43  ;;  %v2409_v54 = vcombine.low %v439_v42, %v443_v43  ;;  %v244_v41 = vld [vmem:[#allocation5 + $0x70] sm:$0xff]  ;;  %v2805_v42 = vpack.c.bf16 %v224_v32, %v224_v32  ;;  %v241_v43 = vld [vmem:[#allocation5 + $0x58] sm:$0xff] }
  0x9e   : > { %1812 = vmatpush1.bf16.msra.mxu0 %v2343_v48  ;;  %1894 = vmatpush1.bf16.msra.mxu1 %v2345_v50  ;;  %v446_v48 = vld [vmem:[#allocation5 + $0x6c0] sm:$0xff] }
  0x9f   : > { %1813 = vmatprep.subr.bf16.mxu0 %v2352_v51  ;;  %1895 = vmatprep.subr.bf16.mxu1 %v2354_v52  ;;  %v450_v50 = vld [vmem:[#allocation5 + $0x6e0] sm:$0xff]  ;;  %v447_v51 = vld [vmem:[#allocation5 + $0x6c8] sm:$0xff] }
  0xa0   : > { %v451_v52 = vld [vmem:[#allocation5 + $0x6e8] sm:$0xff]  ;;  %v2416_v55 = vcombine.high %v446_v48, %v450_v50  ;;  %v2415_v61 = vcombine.low %v446_v48, %v450_v50  ;;  %v248_v50 = vld [vmem:[#allocation5 + $0x90] sm:$0xff] }
  0xa1   : > { %v2418_v56 = vcombine.high %v447_v51, %v451_v52  ;;  %v2417_v63 = vcombine.low %v447_v51, %v451_v52  ;;  %v252_v51 = vld [vmem:[#allocation5 + $0xb0] sm:$0xff]  ;;  %v249_v52 = vld [vmem:[#allocation5 + $0x98] sm:$0xff] }
  0xa2   : > { %1814 = vmatpush1.bf16.msra.mxu0 %v2351_v57  ;;  %1896 = vmatpush1.bf16.msra.mxu1 %v2353_v58  ;;  %v454_v57 = vld [vmem:[#allocation5 + $0x700] sm:$0xff]  ;;  %v2219_v62 = vcombine.low %v248_v50, %v252_v51 }
  0xa3   : > { %1815 = vmatprep.subr.bf16.mxu0 %v2360_v59  ;;  %1897 = vmatprep.subr.bf16.mxu1 %v2362_v60  ;;  %v458_v58 = vld [vmem:[#allocation5 + $0x720] sm:$0xff]  ;;  %v455_v59 = vld [vmem:[#allocation5 + $0x708] sm:$0xff] }
  0xa4   : > { %v459_v60 = vld [vmem:[#allocation5 + $0x728] sm:$0xff]  ;;  %v2424_v0 = vcombine.high %v454_v57, %v458_v58  ;;  %v2423_v7 = vcombine.low %v454_v57, %v458_v58  ;;  %v256_v58 = vld [vmem:[#allocation5 + $0xd0] sm:$0xff] }
  0xa5   : > { %v2425_v8 = vcombine.low %v455_v59, %v459_v60 }
  0xa6   : > { %1816 = vmatpush1.bf16.msra.mxu0 %v2359_v1  ;;  %1898 = vmatpush1.bf16.msra.mxu1 %v2361_v2  ;;  %v2426_v1 = vcombine.high %v455_v59, %v459_v60  ;;  %v462_v2 = vld [vmem:[#allocation5 + $0x740] sm:$0xff]  ;;  %v260_v59 = vld [vmem:[#allocation5 + $0xf0] sm:$0xff]  ;;  %v257_v60 = vld [vmem:[#allocation5 + $0xd8] sm:$0xff] }
  0xa7   : > { %1817 = vmatprep.subr.bf16.mxu0 %v2368_v3  ;;  %1899 = vmatprep.subr.bf16.mxu1 %v2370_v4  ;;  %v466_v3 = vld [vmem:[#allocation5 + $0x760] sm:$0xff]  ;;  %v463_v4 = vld [vmem:[#allocation5 + $0x748] sm:$0xff]  ;;  %v2227_v6 = vcombine.low %v256_v58, %v260_v59 }
  0xa8   : > { %v2431_v17 = vcombine.low %v462_v2, %v466_v3 }
  0xaa   : > { %1818 = vmatpush1.bf16.msra.mxu0 %v2367_v9  ;;  %1900 = vmatpush1.bf16.msra.mxu1 %v2369_v10  ;;  %v2432_v9 = vcombine.high %v462_v2, %v466_v3  ;;  %v2434_v10 = vcombine.high %v463_v4, %v467_v5  ;;  %v264_v2 = vld [vmem:[#allocation5 + $0x110] sm:$0xff] }
  0xab   : > { %1819 = vmatprep.subr.bf16.mxu0 %v2376_v11  ;;  %1901 = vmatprep.subr.bf16.mxu1 %v2378_v12  ;;  %v470_v11 = vld [vmem:[#allocation5 + $0x780] sm:$0xff]  ;;  %v268_v3 = vld [vmem:[#allocation5 + $0x130] sm:$0xff] }
  0xac   : > { %v474_v12 = vld [vmem:[#allocation5 + $0x7a0] sm:$0xff] }
  0xad   : > { %v2439_v25 = vcombine.low %v470_v11, %v474_v12 }
  0xae   : > { %1820 = vmatpush1.bf16.msra.mxu0 %v2375_v18  ;;  %1902 = vmatpush1.bf16.msra.mxu1 %v2377_v19  ;;  %v2433_v18 = vcombine.low %v463_v4, %v467_v5  ;;  %v2440_v19 = vcombine.high %v470_v11, %v474_v12  ;;  %v265_v4 = vld [vmem:[#allocation5 + $0x118] sm:$0xff] }
  0xaf   : > { %1821 = vmatprep.subr.bf16.mxu0 %v2384_v20  ;;  %1903 = vmatprep.subr.bf16.mxu1 %v2386_v21  ;;  %v478_v20 = vld [vmem:[#allocation5 + $0x7c0] sm:$0xff]  ;;  %v269_v5 = vld [vmem:[#allocation5 + $0x138] sm:$0xff] }
  0xb0   : > { %v482_v21 = vld [vmem:[#allocation5 + $0x7e0] sm:$0xff]  ;;  %v273_v11 = vld [vmem:[#allocation5 + $0x158] sm:$0xff] }
  0xb1   : > { %v277_v12 = vld [vmem:[#allocation5 + $0x178] sm:$0xff] }
  0xb2   : > { %1822 = vmatpush1.bf16.msra.mxu0 %v2383_v26  ;;  %1904 = vmatpush1.bf16.msra.mxu1 %v2385_v27  ;;  %v2441_v26 = vcombine.low %v471_v13, %v475_v14  ;;  %v2448_v27 = vcombine.high %v478_v20, %v482_v21  ;;  %v2235_v13 = vcombine.low %v264_v2, %v268_v3 }
  0xb3   : > { %1823 = vmatprep.subr.bf16.mxu0 %v2392_v29  ;;  %1905 = vmatprep.subr.bf16.mxu1 %v2394_v30  ;;  %v2450_v29 = vcombine.high %v479_v22, %v483_v23  ;;  %v232_v30 = vld [vmem:[#allocation5 + $0x10] sm:$0xff]  ;;  %v2237_v14 = vcombine.low %v265_v4, %v269_v5 }
  0xb6   : > { %1824 = vmatpush1.bf16.msra.mxu0 %v2391_v35  ;;  %1906 = vmatpush1.bf16.msra.mxu1 %v2393_v36  ;;  %v2447_v35 = vcombine.low %v478_v20, %v482_v21  ;;  %v2449_v36 = vcombine.low %v479_v22, %v483_v23  ;;  %v285_v20 = vld [vmem:[#allocation5 + $0x1b8] sm:$0xff]  ;;  %v2245_v22 = vcombine.low %v273_v11, %v277_v12 }
  0xb7   : > { %1825 = vmatprep.subr.bf16.mxu0 %v2400_v38  ;;  %1907 = vmatprep.subr.bf16.mxu1 %v2402_v39  ;;  %v2204_v38 = vcombine.high %v232_v30, %v236_v31  ;;  %v2206_v39 = vcombine.high %v233_v33, %v237_v34 }
  0xba   : > { %1826 = vmatpush1.bf16.msra.mxu0 %v2399_v44  ;;  %1908 = vmatpush1.bf16.msra.mxu1 %v2401_v45  ;;  %v245_v44 = vld [vmem:[#allocation5 + $0x78] sm:$0xff]  ;;  %v2203_v45 = vcombine.low %v232_v30, %v236_v31 }
  0xbb   : > { %1827 = vmatprep.subr.bf16.mxu0 %v2408_v46  ;;  %1909 = vmatprep.subr.bf16.mxu1 %v2410_v47  ;;  %v2205_v46 = vcombine.low %v233_v33, %v237_v34  ;;  %v2212_v47 = vcombine.high %v240_v40, %v244_v41  ;;  %v2214_v48 = vcombine.high %v241_v43, %v245_v44  ;;  %v296_v34 = vld [vmem:[#allocation5 + $0x210] sm:$0xff] }
  0xbe   : > { %1828 = vmatpush1.bf16.msra.mxu0 %v2407_v53  ;;  %1910 = vmatpush1.bf16.msra.mxu1 %v2409_v54  ;;  %v253_v53 = vld [vmem:[#allocation5 + $0xb8] sm:$0xff]  ;;  %v2211_v54 = vcombine.low %v240_v40, %v244_v41 }
  0xbf   : > { %1829 = vmatprep.subr.bf16.mxu0 %v2416_v55  ;;  %1911 = vmatprep.subr.bf16.mxu1 %v2418_v56  ;;  %v2213_v55 = vcombine.low %v241_v43, %v245_v44  ;;  %v2220_v56 = vcombine.high %v248_v50, %v252_v51  ;;  %v2222_v57 = vcombine.high %v249_v52, %v253_v53  ;;  %v304_v44 = vld [vmem:[#allocation5 + $0x250] sm:$0xff] }
  0xc2   : > { %1830 = vmatpush1.bf16.msra.mxu0 %v2415_v61  ;;  %1912 = vmatpush1.bf16.msra.mxu1 %v2417_v63  ;;  %v261_v61 = vld [vmem:[#allocation5 + $0xf8] sm:$0xff]  ;;  %v2221_v63 = vcombine.low %v249_v52, %v253_v53  ;;  %v312_v53 = vld [vmem:[#allocation5 + $0x290] sm:$0xff] }
  0xc3   : > { %1831 = vmatprep.subr.bf16.mxu0 %v2424_v0  ;;  %1913 = vmatprep.subr.bf16.mxu1 %v2426_v1  ;;  %v2228_v0 = vcombine.high %v256_v58, %v260_v59  ;;  %v2230_v1 = vcombine.high %v257_v60, %v261_v61 }
  0xc6   : > { %1832 = vmatpush1.bf16.msra.mxu0 %v2423_v7  ;;  %1914 = vmatpush1.bf16.msra.mxu1 %v2425_v8  ;;  %v2229_v7 = vcombine.low %v257_v60, %v261_v61  ;;  %v2236_v8 = vcombine.high %v264_v2, %v268_v3  ;;  %v320_v61 = vld [vmem:[#allocation5 + $0x2d0] sm:$0xff] }
  0xc7   : > { %1833 = vmatprep.subr.bf16.mxu0 %v2432_v9  ;;  %1915 = vmatprep.subr.bf16.mxu1 %v2434_v10  ;;  %v272_v9 = vld [vmem:[#allocation5 + $0x150] sm:$0xff] }
  0xc8   : > { %v276_v10 = vld [vmem:[#allocation5 + $0x170] sm:$0xff] }
  0xc9   : > { %v2244_v16 = vcombine.high %v272_v9, %v276_v10  ;;  %v2243_v21 = vcombine.low %v272_v9, %v276_v10 }
  0xca   : > { %1834 = vmatpush1.bf16.msra.mxu0 %v2431_v17  ;;  %1916 = vmatpush1.bf16.msra.mxu1 %v2433_v18  ;;  %v2246_v17 = vcombine.high %v273_v11, %v277_v12  ;;  %v280_v18 = vld [vmem:[#allocation5 + $0x190] sm:$0xff] }
  0xcb   : > { %1835 = vmatprep.subr.bf16.mxu0 %v2440_v19  ;;  %1917 = vmatprep.subr.bf16.mxu1 %v2442_v49  ;;  %v284_v19 = vld [vmem:[#allocation5 + $0x1b0] sm:$0xff]  ;;  %v281_v49 = vld [vmem:[#allocation5 + $0x198] sm:$0xff] }
  0xcc   : > { %v2252_v23 = vcombine.high %v280_v18, %v284_v19  ;;  %v2254_v24 = vcombine.high %v281_v49, %v285_v20  ;;  %v2251_v30 = vcombine.low %v280_v18, %v284_v19  ;;  %v2253_v31 = vcombine.low %v281_v49, %v285_v20  ;;  %v336_v12 = vld [vmem:[#allocation5 + $0x350] sm:$0xff] }
  0xcd   : > { %v344_v20 = vld [vmem:[#allocation5 + $0x390] sm:$0xff] }
  0xce   : > { %1836 = vmatpush1.bf16.msra.mxu0 %v2439_v25  ;;  %1918 = vmatpush1.bf16.msra.mxu1 %v2441_v26  ;;  %v288_v25 = vld [vmem:[#allocation5 + $0x1d0] sm:$0xff] }
  0xcf   : > { %1837 = vmatprep.subr.bf16.mxu0 %v2448_v27  ;;  %1919 = vmatprep.subr.bf16.mxu1 %v2450_v29  ;;  %v292_v26 = vld [vmem:[#allocation5 + $0x1f0] sm:$0xff]  ;;  %v289_v27 = vld [vmem:[#allocation5 + $0x1d8] sm:$0xff] }
  0xd0   : > { %v293_v29 = vld [vmem:[#allocation5 + $0x1f8] sm:$0xff]  ;;  %v2260_v32 = vcombine.high %v288_v25, %v292_v26 }
  0xd1   : > { %v2262_v33 = vcombine.high %v289_v27, %v293_v29  ;;  %v2261_v40 = vcombine.low %v289_v27, %v293_v29  ;;  %v352_v29 = vld [vmem:[#allocation5 + $0x3d0] sm:$0xff] }
  0xd2   : > { %1838 = vmatpush1.bf16.msra.mxu0 %v2447_v35  ;;  %1920 = vmatpush1.bf16.msra.mxu1 %v2449_v36  ;;  %v300_v35 = vld [vmem:[#allocation5 + $0x230] sm:$0xff]  ;;  %v297_v36 = vld [vmem:[#allocation5 + $0x218] sm:$0xff] }
  0xd3   : > { %1930 = vmatprep.subr.bf16.mxu0 %v2204_v38  ;;  %2012 = vmatprep.subr.bf16.mxu1 %v2206_v39  ;;  %v301_v38 = vld [vmem:[#allocation5 + $0x238] sm:$0xff]  ;;  %v2259_v39 = vcombine.low %v288_v25, %v292_v26  ;;  %v2268_v41 = vcombine.high %v296_v34, %v300_v35 }
  0xd4   : > { %v2270_v43 = vcombine.high %v297_v36, %v301_v38  ;;  %v2269_v50 = vcombine.low %v297_v36, %v301_v38  ;;  %v360_v38 = vld [vmem:[#allocation5 + $0x410] sm:$0xff] }
  0xd5   : > { %1840 = vmatmul.mubr.bf16.vlgmr.msra.gmra.mrb[0].mxu0 %v2805_v42  ;;  %1922 = vmatmul.mubr.bf16.vlgmr.msra.gmra.mrb[0].mxu1 %v2805_v42 }
  0xd6   : > { %1931 = vmatpush1.bf16.msra.mxu0 %v2203_v45  ;;  %2013 = vmatpush1.bf16.msra.mxu1 %v2205_v46  ;;  %v308_v45 = vld [vmem:[#allocation5 + $0x270] sm:$0xff]  ;;  %v305_v46 = vld [vmem:[#allocation5 + $0x258] sm:$0xff] }
  0xd7   : > { %1932 = vmatprep.subr.bf16.mxu0 %v2212_v47  ;;  %2014 = vmatprep.subr.bf16.mxu1 %v2214_v48  ;;  %v309_v47 = vld [vmem:[#allocation5 + $0x278] sm:$0xff]  ;;  %v2267_v48 = vcombine.low %v296_v34, %v300_v35  ;;  %v2276_v51 = vcombine.high %v304_v44, %v308_v45 }
  0xd8   : > { %1962 = vmatprep.mubr.bf16.mxu0 %v2787_v15  ;;  %2044 = vmatprep.mubr.bf16.mxu1 %v2787_v15  ;;  %v2238_v15 = vcombine.high %v265_v4, %v269_v5  ;;  %v2278_v52 = vcombine.high %v305_v46, %v309_v47  ;;  %v2277_v58 = vcombine.low %v305_v46, %v309_v47  ;;  %v328_v5 = vld [vmem:[#allocation5 + $0x310] sm:$0xff] }
  0xd9   : > { %v368_v47 = vld [vmem:[#allocation5 + $0x450] sm:$0xff] }
  0xda   : > { %1933 = vmatpush1.bf16.msra.mxu0 %v2211_v54  ;;  %2015 = vmatpush1.bf16.msra.mxu1 %v2213_v55  ;;  %v316_v54 = vld [vmem:[#allocation5 + $0x2b0] sm:$0xff]  ;;  %v313_v55 = vld [vmem:[#allocation5 + $0x298] sm:$0xff] }
  0xdb   : > { %1934 = vmatprep.subr.bf16.mxu0 %v2220_v56  ;;  %2016 = vmatprep.subr.bf16.mxu1 %v2222_v57  ;;  %v317_v56 = vld [vmem:[#allocation5 + $0x2b8] sm:$0xff]  ;;  %v2275_v57 = vcombine.low %v304_v44, %v308_v45  ;;  %v2284_v59 = vcombine.high %v312_v53, %v316_v54 }
  0xdc   : > { %v2286_v60 = vcombine.high %v313_v55, %v317_v56  ;;  %v2285_v2 = vcombine.low %v313_v55, %v317_v56  ;;  %v376_v56 = vld [vmem:[#allocation5 + $0x490] sm:$0xff] }
  0xde   : > { %1935 = vmatpush1.bf16.msra.mxu0 %v2219_v62  ;;  %2017 = vmatpush1.bf16.msra.mxu1 %v2221_v63  ;;  %v324_v62 = vld [vmem:[#allocation5 + $0x2f0] sm:$0xff]  ;;  %v321_v63 = vld [vmem:[#allocation5 + $0x2d8] sm:$0xff] }
  0xdf   : > { %1936 = vmatprep.subr.bf16.mxu0 %v2228_v0  ;;  %2018 = vmatprep.subr.bf16.mxu1 %v2230_v1  ;;  %v325_v0 = vld [vmem:[#allocation5 + $0x2f8] sm:$0xff]  ;;  %v2283_v1 = vcombine.low %v312_v53, %v316_v54  ;;  %v2292_v3 = vcombine.high %v320_v61, %v324_v62 }
  0xe0   : > { %v2294_v4 = vcombine.high %v321_v63, %v325_v0  ;;  %v2293_v9 = vcombine.low %v321_v63, %v325_v0  ;;  %v384_v0 = vld [vmem:[#allocation5 + $0x4d0] sm:$0xff] }
  0xe2   : > { %1937 = vmatpush1.bf16.msra.mxu0 %v2227_v6  ;;  %2019 = vmatpush1.bf16.msra.mxu1 %v2229_v7  ;;  %v332_v6 = vld [vmem:[#allocation5 + $0x330] sm:$0xff]  ;;  %v329_v7 = vld [vmem:[#allocation5 + $0x318] sm:$0xff] }
  0xe3   : > { %1938 = vmatprep.subr.bf16.mxu0 %v2236_v8  ;;  %2020 = vmatprep.subr.bf16.mxu1 %v2238_v15  ;;  %v333_v8 = vld [vmem:[#allocation5 + $0x338] sm:$0xff]  ;;  %v2291_v15 = vcombine.low %v320_v61, %v324_v62  ;;  %v2300_v10 = vcombine.high %v328_v5, %v332_v6 }
  0xe4   : > { %v2302_v11 = vcombine.high %v329_v7, %v333_v8  ;;  %v2301_v18 = vcombine.low %v329_v7, %v333_v8  ;;  %v392_v7 = vld [vmem:[#allocation5 + $0x510] sm:$0xff] }
  0xe5   : > { %v396_v8 = vld [vmem:[#allocation5 + $0x530] sm:$0xff] }
  0xe6   : > { %1939 = vmatpush1.bf16.msra.mxu0 %v2235_v13  ;;  %2021 = vmatpush1.bf16.msra.mxu1 %v2237_v14  ;;  %v340_v13 = vld [vmem:[#allocation5 + $0x370] sm:$0xff]  ;;  %v337_v14 = vld [vmem:[#allocation5 + $0x358] sm:$0xff] }
  0xe7   : > { %1940 = vmatprep.subr.bf16.mxu0 %v2244_v16  ;;  %2022 = vmatprep.subr.bf16.mxu1 %v2246_v17  ;;  %v341_v16 = vld [vmem:[#allocation5 + $0x378] sm:$0xff]  ;;  %v2299_v17 = vcombine.low %v328_v5, %v332_v6  ;;  %v2308_v19 = vcombine.high %v336_v12, %v340_v13 }
  0xe8   : > { %v2310_v49 = vcombine.high %v337_v14, %v341_v16  ;;  %v2309_v25 = vcombine.low %v337_v14, %v341_v16  ;;  %v404_v14 = vld [vmem:[#allocation5 + $0x570] sm:$0xff]  ;;  %v401_v16 = vld [vmem:[#allocation5 + $0x558] sm:$0xff] }
  0xea   : > { %1941 = vmatpush1.bf16.msra.mxu0 %v2243_v21  ;;  %2023 = vmatpush1.bf16.msra.mxu1 %v2245_v22  ;;  %v348_v21 = vld [vmem:[#allocation5 + $0x3b0] sm:$0xff]  ;;  %v345_v22 = vld [vmem:[#allocation5 + $0x398] sm:$0xff] }
  0xeb   : > { %1942 = vmatprep.subr.bf16.mxu0 %v2252_v23  ;;  %2024 = vmatprep.subr.bf16.mxu1 %v2254_v24  ;;  %v349_v23 = vld [vmem:[#allocation5 + $0x3b8] sm:$0xff]  ;;  %v2307_v24 = vcombine.low %v336_v12, %v340_v13  ;;  %v2316_v26 = vcombine.high %v344_v20, %v348_v21  ;;  %v2364_v12 = vcombine.high %v392_v7, %v396_v8  ;;  %v400_v13 = vld [vmem:[#allocation5 + $0x550] sm:$0xff] }
  0xec   : > { %v2318_v27 = vcombine.high %v345_v22, %v349_v23  ;;  %v2317_v34 = vcombine.low %v345_v22, %v349_v23  ;;  %v412_v22 = vld [vmem:[#allocation5 + $0x5b0] sm:$0xff]  ;;  %v409_v23 = vld [vmem:[#allocation5 + $0x598] sm:$0xff] }
  0xee   : > { %1943 = vmatpush1.bf16.msra.mxu0 %v2251_v30  ;;  %2025 = vmatpush1.bf16.msra.mxu1 %v2253_v31  ;;  %v356_v30 = vld [vmem:[#allocation5 + $0x3f0] sm:$0xff]  ;;  %v353_v31 = vld [vmem:[#allocation5 + $0x3d8] sm:$0xff] }
  0xef   : > { %1944 = vmatprep.subr.bf16.mxu0 %v2260_v32  ;;  %2026 = vmatprep.subr.bf16.mxu1 %v2262_v33  ;;  %v357_v32 = vld [vmem:[#allocation5 + $0x3f8] sm:$0xff]  ;;  %v2315_v33 = vcombine.low %v344_v20, %v348_v21  ;;  %v2324_v35 = vcombine.high %v352_v29, %v356_v30  ;;  %v408_v21 = vld [vmem:[#allocation5 + $0x590] sm:$0xff] }
  0xf0   : > { %v2326_v36 = vcombine.high %v353_v31, %v357_v32  ;;  %v2325_v44 = vcombine.low %v353_v31, %v357_v32  ;;  %v420_v31 = vld [vmem:[#allocation5 + $0x5f0] sm:$0xff]  ;;  %v417_v32 = vld [vmem:[#allocation5 + $0x5d8] sm:$0xff] }
  0xf2   : > { %1945 = vmatpush1.bf16.msra.mxu0 %v2259_v39  ;;  %2027 = vmatpush1.bf16.msra.mxu1 %v2261_v40  ;;  %v364_v39 = vld [vmem:[#allocation5 + $0x430] sm:$0xff]  ;;  %v361_v40 = vld [vmem:[#allocation5 + $0x418] sm:$0xff] }
  0xf3   : > { %1946 = vmatprep.subr.bf16.mxu0 %v2268_v41  ;;  %2028 = vmatprep.subr.bf16.mxu1 %v2270_v43  ;;  %v365_v41 = vld [vmem:[#allocation5 + $0x438] sm:$0xff]  ;;  %v2323_v43 = vcombine.low %v352_v29, %v356_v30  ;;  %v2332_v45 = vcombine.high %v360_v38, %v364_v39  ;;  %v416_v30 = vld [vmem:[#allocation5 + $0x5d0] sm:$0xff] }
  0xf4   : > { %v2334_v46 = vcombine.high %v361_v40, %v365_v41  ;;  %v2333_v53 = vcombine.low %v361_v40, %v365_v41  ;;  %v428_v40 = vld [vmem:[#allocation5 + $0x630] sm:$0xff]  ;;  %v425_v41 = vld [vmem:[#allocation5 + $0x618] sm:$0xff] }
  0xf6   : > { %1947 = vmatpush1.bf16.msra.mxu0 %v2267_v48  ;;  %2029 = vmatpush1.bf16.msra.mxu1 %v2269_v50  ;;  %v372_v48 = vld [vmem:[#allocation5 + $0x470] sm:$0xff]  ;;  %v369_v50 = vld [vmem:[#allocation5 + $0x458] sm:$0xff] }
  0xf7   : > { %1948 = vmatprep.subr.bf16.mxu0 %v2276_v51  ;;  %2030 = vmatprep.subr.bf16.mxu1 %v2278_v52  ;;  %v373_v51 = vld [vmem:[#allocation5 + $0x478] sm:$0xff]  ;;  %v2331_v52 = vcombine.low %v360_v38, %v364_v39  ;;  %v2340_v54 = vcombine.high %v368_v47, %v372_v48  ;;  %v424_v39 = vld [vmem:[#allocation5 + $0x610] sm:$0xff] }
  0xf8   : > { %v2342_v55 = vcombine.high %v369_v50, %v373_v51  ;;  %v2341_v61 = vcombine.low %v369_v50, %v373_v51  ;;  %v436_v50 = vld [vmem:[#allocation5 + $0x670] sm:$0xff]  ;;  %v433_v51 = vld [vmem:[#allocation5 + $0x658] sm:$0xff] }
  0xfa   : > { %1949 = vmatpush1.bf16.msra.mxu0 %v2275_v57  ;;  %2031 = vmatpush1.bf16.msra.mxu1 %v2277_v58  ;;  %v380_v57 = vld [vmem:[#allocation5 + $0x4b0] sm:$0xff]  ;;  %v377_v58 = vld [vmem:[#allocation5 + $0x498] sm:$0xff] }
  0xfb   : > { %1950 = vmatprep.subr.bf16.mxu0 %v2284_v59  ;;  %2032 = vmatprep.subr.bf16.mxu1 %v2286_v60  ;;  %v381_v59 = vld [vmem:[#allocation5 + $0x4b8] sm:$0xff]  ;;  %v2339_v60 = vcombine.low %v368_v47, %v372_v48  ;;  %v2348_v62 = vcombine.high %v376_v56, %v380_v57  ;;  %v432_v48 = vld [vmem:[#allocation5 + $0x650] sm:$0xff] }
  0xfc   : > { %v2350_v63 = vcombine.high %v377_v58, %v381_v59 }
  0xfe   : > { %1951 = vmatpush1.bf16.msra.mxu0 %v2283_v1  ;;  %2033 = vmatpush1.bf16.msra.mxu1 %v2285_v2  ;;  %v388_v1 = vld [vmem:[#allocation5 + $0x4f0] sm:$0xff]  ;;  %v385_v2 = vld [vmem:[#allocation5 + $0x4d8] sm:$0xff] }
  0xff   : > { %1952 = vmatprep.subr.bf16.mxu0 %v2292_v3  ;;  %2034 = vmatprep.subr.bf16.mxu1 %v2294_v4  ;;  %v389_v3 = vld [vmem:[#allocation5 + $0x4f8] sm:$0xff]  ;;  %v2347_v4 = vcombine.low %v376_v56, %v380_v57  ;;  %v2356_v5 = vcombine.high %v384_v0, %v388_v1  ;;  %v440_v57 = vld [vmem:[#allocation5 + $0x690] sm:$0xff] }
 0x100   : > { %v2358_v6 = vcombine.high %v385_v2, %v389_v3 }
 0x102   : > { %1953 = vmatpush1.bf16.msra.mxu0 %v2291_v15  ;;  %2035 = vmatpush1.bf16.msra.mxu1 %v2293_v9  ;;  %v393_v15 = vld [vmem:[#allocation5 + $0x518] sm:$0xff] }
 0x103   : > { %1954 = vmatprep.subr.bf16.mxu0 %v2300_v10  ;;  %2036 = vmatprep.subr.bf16.mxu1 %v2302_v11  ;;  %v397_v9 = vld [vmem:[#allocation5 + $0x538] sm:$0xff]  ;;  %v2355_v10 = vcombine.low %v384_v0, %v388_v1  ;;  %v2357_v11 = vcombine.low %v385_v2, %v389_v3  ;;  %v448_v1 = vld [vmem:[#allocation5 + $0x6d0] sm:$0xff] }
 0x104   : > { %v452_v2 = vld [vmem:[#allocation5 + $0x6f0] sm:$0xff]  ;;  %v449_v3 = vld [vmem:[#allocation5 + $0x6d8] sm:$0xff] }
 0x106   : > { %1955 = vmatpush1.bf16.msra.mxu0 %v2299_v17  ;;  %2037 = vmatpush1.bf16.msra.mxu1 %v2301_v18  ;;  %v405_v17 = vld [vmem:[#allocation5 + $0x578] sm:$0xff]  ;;  %v2363_v18 = vcombine.low %v392_v7, %v396_v8  ;;  %v456_v8 = vld [vmem:[#allocation5 + $0x710] sm:$0xff] }
 0x107   : > { %1956 = vmatprep.subr.bf16.mxu0 %v2308_v19  ;;  %2038 = vmatprep.subr.bf16.mxu1 %v2310_v49  ;;  %v2365_v19 = vcombine.low %v393_v15, %v397_v9  ;;  %v2372_v49 = vcombine.high %v400_v13, %v404_v14  ;;  %v2374_v20 = vcombine.high %v401_v16, %v405_v17 }
 0x10a   : > { %1957 = vmatpush1.bf16.msra.mxu0 %v2307_v24  ;;  %2039 = vmatpush1.bf16.msra.mxu1 %v2309_v25  ;;  %v413_v24 = vld [vmem:[#allocation5 + $0x5b8] sm:$0xff]  ;;  %v2371_v25 = vcombine.low %v400_v13, %v404_v14  ;;  %v464_v14 = vld [vmem:[#allocation5 + $0x750] sm:$0xff] }
 0x10b   : > { %1958 = vmatprep.subr.bf16.mxu0 %v2316_v26  ;;  %2040 = vmatprep.subr.bf16.mxu1 %v2318_v27  ;;  %v2373_v26 = vcombine.low %v401_v16, %v405_v17  ;;  %v2380_v27 = vcombine.high %v408_v21, %v412_v22  ;;  %v2382_v29 = vcombine.high %v409_v23, %v413_v24  ;;  %v468_v16 = vld [vmem:[#allocation5 + $0x770] sm:$0xff]  ;;  %v465_v17 = vld [vmem:[#allocation5 + $0x758] sm:$0xff] }
 0x10e   : > { %1959 = vmatpush1.bf16.msra.mxu0 %v2315_v33  ;;  %2041 = vmatpush1.bf16.msra.mxu1 %v2317_v34  ;;  %v421_v33 = vld [vmem:[#allocation5 + $0x5f8] sm:$0xff]  ;;  %v2379_v34 = vcombine.low %v408_v21, %v412_v22  ;;  %v472_v22 = vld [vmem:[#allocation5 + $0x790] sm:$0xff] }
 0x10f   : > { %1960 = vmatprep.subr.bf16.mxu0 %v2324_v35  ;;  %2042 = vmatprep.subr.bf16.mxu1 %v2326_v36  ;;  %v2381_v35 = vcombine.low %v409_v23, %v413_v24  ;;  %v2388_v36 = vcombine.high %v416_v30, %v420_v31  ;;  %v2390_v38 = vcombine.high %v417_v32, %v421_v33  ;;  %v476_v23 = vld [vmem:[#allocation5 + $0x7b0] sm:$0xff]  ;;  %v473_v24 = vld [vmem:[#allocation5 + $0x798] sm:$0xff] }
 0x112   : > { %1961 = vmatpush1.bf16.msra.mxu0 %v2323_v43  ;;  %2043 = vmatpush1.bf16.msra.mxu1 %v2325_v44  ;;  %v429_v43 = vld [vmem:[#allocation5 + $0x638] sm:$0xff]  ;;  %v2387_v44 = vcombine.low %v416_v30, %v420_v31  ;;  %v480_v31 = vld [vmem:[#allocation5 + $0x7d0] sm:$0xff] }
 0x113   : > { %1971 = vmatprep.subr.bf16.mxu0 %v2332_v45  ;;  %2053 = vmatprep.subr.bf16.mxu1 %v2334_v46  ;;  %v2389_v45 = vcombine.low %v417_v32, %v421_v33  ;;  %v2396_v46 = vcombine.high %v424_v39, %v428_v40  ;;  %v2398_v47 = vcombine.high %v425_v41, %v429_v43  ;;  %v484_v32 = vld [vmem:[#allocation5 + $0x7f0] sm:$0xff]  ;;  %v481_v33 = vld [vmem:[#allocation5 + $0x7d8] sm:$0xff] }
 0x115   : > { %1963 = vmatmul.mubr.bf16.vlgmr.msra.gmra.mrb[4].mxu0 %v2795_v28  ;;  %2045 = vmatmul.mubr.bf16.vlgmr.msra.gmra.mrb[4].mxu1 %v2795_v28  ;;  %v2349_v28 = vcombine.low %v377_v58, %v381_v59  ;;  %v444_v58 = vld [vmem:[#allocation5 + $0x6b0] sm:$0xff]  ;;  %v441_v59 = vld [vmem:[#allocation5 + $0x698] sm:$0xff] }
 0x116   : > { %1972 = vmatpush1.bf16.msra.mxu0 %v2331_v52  ;;  %2054 = vmatpush1.bf16.msra.mxu1 %v2333_v53  ;;  %v437_v52 = vld [vmem:[#allocation5 + $0x678] sm:$0xff]  ;;  %v2395_v53 = vcombine.low %v424_v39, %v428_v40  ;;  %v2451_v40 = vcombine.low %v480_v31, %v484_v32 }
 0x117   : > { %1973 = vmatprep.subr.bf16.mxu0 %v2340_v54  ;;  %2055 = vmatprep.subr.bf16.mxu1 %v2342_v55  ;;  %v2397_v54 = vcombine.low %v425_v41, %v429_v43  ;;  %v2404_v55 = vcombine.high %v432_v48, %v436_v50  ;;  %v2406_v56 = vcombine.high %v433_v51, %v437_v52 }
 0x118   : > { %2003 = vmatprep.mubr.bf16.mxu0 %v2797_v37  ;;  %2085 = vmatprep.mubr.bf16.mxu1 %v2797_v37  ;;  %v2366_v37 = vcombine.high %v393_v15, %v397_v9  ;;  %v460_v15 = vld [vmem:[#allocation5 + $0x730] sm:$0xff]  ;;  %v457_v9 = vld [vmem:[#allocation5 + $0x718] sm:$0xff] }
 0x11a   : > { %1974 = vmatpush1.bf16.msra.mxu0 %v2339_v60  ;;  %2056 = vmatpush1.bf16.msra.mxu1 %v2341_v61  ;;  %v445_v60 = vld [vmem:[#allocation5 + $0x6b8] sm:$0xff]  ;;  %v2403_v61 = vcombine.low %v432_v48, %v436_v50 }
 0x11b   : > { %1975 = vmatprep.subr.bf16.mxu0 %v2348_v62  ;;  %2057 = vmatprep.subr.bf16.mxu1 %v2350_v63  ;;  %v2405_v62 = vcombine.low %v433_v51, %v437_v52  ;;  %v2412_v63 = vcombine.high %v440_v57, %v444_v58  ;;  %v2414_v0 = vcombine.high %v441_v59, %v445_v60 }
 0x11e   : > { %1976 = vmatpush1.bf16.msra.mxu0 %v2347_v4  ;;  %2058 = vmatpush1.bf16.msra.mxu1 %v2349_v28  ;;  %v453_v4 = vld [vmem:[#allocation5 + $0x6f8] sm:$0xff]  ;;  %v2411_v28 = vcombine.low %v440_v57, %v444_v58 }
 0x11f   : > { %1977 = vmatprep.subr.bf16.mxu0 %v2356_v5  ;;  %2059 = vmatprep.subr.bf16.mxu1 %v2358_v6  ;;  %v2413_v5 = vcombine.low %v441_v59, %v445_v60  ;;  %v2420_v6 = vcombine.high %v448_v1, %v452_v2  ;;  %v2422_v7 = vcombine.high %v449_v3, %v453_v4 }
 0x122   : > { %1978 = vmatpush1.bf16.msra.mxu0 %v2355_v10  ;;  %2060 = vmatpush1.bf16.msra.mxu1 %v2357_v11  ;;  %v461_v10 = vld [vmem:[#allocation5 + $0x738] sm:$0xff]  ;;  %v2419_v11 = vcombine.low %v448_v1, %v452_v2 }
 0x123   : > { %1979 = vmatprep.subr.bf16.mxu0 %v2364_v12  ;;  %2061 = vmatprep.subr.bf16.mxu1 %v2366_v37  ;;  %v2421_v12 = vcombine.low %v449_v3, %v453_v4  ;;  %v2428_v37 = vcombine.high %v456_v8, %v460_v15  ;;  %v2430_v13 = vcombine.high %v457_v9, %v461_v10 }
 0x126   : > { %1980 = vmatpush1.bf16.msra.mxu0 %v2363_v18  ;;  %2062 = vmatpush1.bf16.msra.mxu1 %v2365_v19  ;;  %v469_v18 = vld [vmem:[#allocation5 + $0x778] sm:$0xff]  ;;  %v2427_v19 = vcombine.low %v456_v8, %v460_v15 }
 0x127   : > { %1981 = vmatprep.subr.bf16.mxu0 %v2372_v49  ;;  %2063 = vmatprep.subr.bf16.mxu1 %v2374_v20  ;;  %v2429_v49 = vcombine.low %v457_v9, %v461_v10  ;;  %v2436_v20 = vcombine.high %v464_v14, %v468_v16  ;;  %v2438_v21 = vcombine.high %v465_v17, %v469_v18 }
 0x12a   : > { %1982 = vmatpush1.bf16.msra.mxu0 %v2371_v25  ;;  %2064 = vmatpush1.bf16.msra.mxu1 %v2373_v26  ;;  %v477_v25 = vld [vmem:[#allocation5 + $0x7b8] sm:$0xff]  ;;  %v2435_v26 = vcombine.low %v464_v14, %v468_v16 }
 0x12b   : > { %1983 = vmatprep.subr.bf16.mxu0 %v2380_v27  ;;  %2065 = vmatprep.subr.bf16.mxu1 %v2382_v29  ;;  %v2437_v27 = vcombine.low %v465_v17, %v469_v18  ;;  %v2444_v29 = vcombine.high %v472_v22, %v476_v23  ;;  %v2446_v30 = vcombine.high %v473_v24, %v477_v25 }
 0x12e   : > { %1984 = vmatpush1.bf16.msra.mxu0 %v2379_v34  ;;  %2066 = vmatpush1.bf16.msra.mxu1 %v2381_v35  ;;  %v485_v34 = vld [vmem:[#allocation5 + $0x7f8] sm:$0xff]  ;;  %v2443_v35 = vcombine.low %v472_v22, %v476_v23 }
 0x12f   : > { %1985 = vmatprep.subr.bf16.mxu0 %v2388_v36  ;;  %2067 = vmatprep.subr.bf16.mxu1 %v2390_v38  ;;  %v2445_v36 = vcombine.low %v473_v24, %v477_v25  ;;  %v2452_v38 = vcombine.high %v480_v31, %v484_v32  ;;  %v2454_v39 = vcombine.high %v481_v33, %v485_v34 }
 0x130   : > { %v2453_v41 = vcombine.low %v481_v33, %v485_v34 }
 0x132   : > { %1986 = vmatpush1.bf16.msra.mxu0 %v2387_v44  ;;  %2068 = vmatpush1.bf16.msra.mxu1 %v2389_v45 }
 0x133   : > { %1987 = vmatprep.subr.bf16.mxu0 %v2396_v46  ;;  %2069 = vmatprep.subr.bf16.mxu1 %v2398_v47 }
 0x136   : > { %1988 = vmatpush1.bf16.msra.mxu0 %v2395_v53  ;;  %2070 = vmatpush1.bf16.msra.mxu1 %v2397_v54 }
 0x137   : > { %1989 = vmatprep.subr.bf16.mxu0 %v2404_v55  ;;  %2071 = vmatprep.subr.bf16.mxu1 %v2406_v56 }
 0x13a   : > { %1990 = vmatpush1.bf16.msra.mxu0 %v2403_v61  ;;  %2072 = vmatpush1.bf16.msra.mxu1 %v2405_v62 }
 0x13b   : > { %1991 = vmatprep.subr.bf16.mxu0 %v2412_v63  ;;  %2073 = vmatprep.subr.bf16.mxu1 %v2414_v0 }
 0x13e   : > { %1992 = vmatpush1.bf16.msra.mxu0 %v2411_v28  ;;  %2074 = vmatpush1.bf16.msra.mxu1 %v2413_v5 }
 0x13f   : > { %1993 = vmatprep.subr.bf16.mxu0 %v2420_v6  ;;  %2075 = vmatprep.subr.bf16.mxu1 %v2422_v7 }
 0x142   : > { %1994 = vmatpush1.bf16.msra.mxu0 %v2419_v11  ;;  %2076 = vmatpush1.bf16.msra.mxu1 %v2421_v12 }
 0x143   : > { %1995 = vmatprep.subr.bf16.mxu0 %v2428_v37  ;;  %2077 = vmatprep.subr.bf16.mxu1 %v2430_v13 }
 0x146   : > { %1996 = vmatpush1.bf16.msra.mxu0 %v2427_v19  ;;  %2078 = vmatpush1.bf16.msra.mxu1 %v2429_v49 }
 0x147   : > { %1997 = vmatprep.subr.bf16.mxu0 %v2436_v20  ;;  %2079 = vmatprep.subr.bf16.mxu1 %v2438_v21 }
 0x14a   : > { %1998 = vmatpush1.bf16.msra.mxu0 %v2435_v26  ;;  %2080 = vmatpush1.bf16.msra.mxu1 %v2437_v27 }
 0x14b   : > { %1999 = vmatprep.subr.bf16.mxu0 %v2444_v29  ;;  %2081 = vmatprep.subr.bf16.mxu1 %v2446_v30 }
 0x14e   : > { %2000 = vmatpush1.bf16.msra.mxu0 %v2443_v35  ;;  %2082 = vmatpush1.bf16.msra.mxu1 %v2445_v36 }
 0x14f   : > { %2001 = vmatprep.subr.bf16.mxu0 %v2452_v38  ;;  %2083 = vmatprep.subr.bf16.mxu1 %v2454_v39 }
 0x152   : > { %2002 = vmatpush1.bf16.msra.mxu0 %v2451_v40  ;;  %2084 = vmatpush1.bf16.msra.mxu1 %v2453_v41 }
 0x155   : > { %2004 = vmatmul.mubr.bf16.vlgmr.msra.gmra.mrb[4].mxu0 %v2805_v42  ;;  %2086 = vmatmul.mubr.bf16.vlgmr.msra.gmra.mrb[4].mxu1 %v2805_v42 }
 0x1a8   : > { %v1841_v43 = vpop.f32.mrb[0].mxu0  ;;  %v1923_v45 = vpop.f32.mrb[0].mxu1 }
 0x1a9   : > { %v2094_v44 = vmax.f32 %v1841_v43, 0.0  ;;  %v1843_v46 = vpop.f32.mrb[1].mxu0  ;;  %v1925_v48 = vpop.f32.mrb[1].mxu1  ;;  %v2096_v53 = vmax.f32 %v1923_v45, 0.0 }
 0x1aa   : > { %v2095_v47 = vmax.f32 %v1843_v46, 0.0  ;;  %v1845_v50 = vpop.f32.mrb[2].mxu0  ;;  %v1927_v51 = vpop.f32.mrb[2].mxu1  ;;  %v2097_v56 = vmax.f32 %v1925_v48, 0.0 }
 0x1ab   : > { %v1846_v52 = vpop.f32.mrb[3].mxu0  ;;  %v1928_v55 = vpop.f32.mrb[3].mxu1 }
 0x1ac   : > { %v2102_v54 = vadd.f32 %v2095_v47, %v2094_v44 }
 0x1ae   : > { %v2103_v57 = vadd.f32 %v2102_v54, %v2096_v53 }
 0x1b0   : > { %v2104_v58 = vadd.f32 %v2103_v57, %v2097_v56 }
 0x228   : > { %v2005_v59 = vpop.f32.mrb[4].mxu0  ;;  %v2087_v61 = vpop.f32.mrb[4].mxu1 }
 0x229   : > { %v2098_v60 = vmax.f32 %v2005_v59, 0.0  ;;  %v2007_v42 = vpop.f32.mrb[5].mxu0  ;;  %v2089_v63 = vpop.f32.mrb[5].mxu1  ;;  %v2100_v28 = vmax.f32 %v2087_v61, 0.0 }
 0x22a   : > { %v2099_v62 = vmax.f32 %v2007_v42, 0.0  ;;  %v2009_v0 = vpop.f32.mrb[6].mxu0  ;;  %v2091_v2 = vpop.f32.mrb[6].mxu1  ;;  %v2101_v6 = vmax.f32 %v2089_v63, 0.0 }
 0x22b   : > { %v2105_v1 = vadd.f32 %v2104_v58, %v2098_v60  ;;  %v2010_v3 = vpop.f32.mrb[7].mxu0  ;;  %v2092_v4 = vpop.f32.mrb[7].mxu1 }
 0x22d   : > { %v2106_v5 = vadd.f32 %v2105_v1, %v2099_v62 }
 0x22f   : > { %v2107_v7 = vadd.f32 %v2106_v5, %v2100_v28 }
 0x231   : > { %v2108_v8 = vadd.f32 %v2107_v7, %v2101_v6 }
 0x233   : > { %2109 = vadd.xlane.f32.xlu0 %v2108_v8 }
 0x2c0   : > { %v2110_v15 = vpop.xlane.xlu0 %2109 }
 0x2c1   : > { %2112 = vst.msk [vmem:[%s202_s27] sm:$0xff] %vm2111_vm0, %v2110_v15 }
 0x2c2 PF: > { %p15_p8 = scmp.ge.s32.totalorder %s2701_s23, 4   ;;  %s2850_s14 = smov %s2620_s15 }
 0x2c3   : > { %s2851_s15 = smov %s2624_s16  ;;  %s2852_s16 = smov %s2727_s11 }
 0x2c4   : > { %s2853_s17 = smov %s2701_s23  ;;  %17 = sbr.rel (!%p15_p8) target bundleno = 6 (0x6), region = 76 }
 0x2cb   :  { %2132 = vsyncpa [#allocation4], 1 }
 0x2cc   :  { %2134 = vsyncpa [#allocation4 + $0x1], 1 }
 0x2cd   :  { %2135 = vsyncpa [#allocation6], 1 }

</bundles_post_ra>
